<compile_context>
chip_gen: v7x
topology: tpu7x:2x2x1
jax: 0.10.0
libtpu: 0.0.40
codegen_flags: <defaults>
</compile_context>

<pallas_src>
import functools

import jax
import jax.numpy as jnp
from jax import lax
from jax.experimental import pallas as pl
from jax.experimental.pallas import tpu as pltpu


def _round_up(v, m):
    return (v + m - 1) // m * m


def _deepseek_mlp_kernel(x_ref, wg_ref, wu_ref, wd_ref, o_ref, acc_ref):
    # x_ref:  (tm, dim)       token tile (compute dtype, e.g. bf16)
    # wg_ref: (tn, dim)       gate_proj weight tile, PyTorch [out, in] layout
    # wu_ref: (tn, dim)       up_proj weight tile
    # wd_ref: (dim, tn)       down_proj weight tile, PyTorch [out, in] layout
    # o_ref:  (tm, dim)       output tile (written on last moe step)
    # acc_ref:(tm, dim) f32   on-chip partial-sum accumulator over moe tiles
    j = pl.program_id(1)

    @pl.when(j == 0)
    def _():
        acc_ref[...] = jnp.zeros_like(acc_ref)

    x = x_ref[...]
    contract_last = (((1,), (1,)), ((), ()))  # contract x's dim axis w/ W's "in" axis

    # g = x @ gate_w.T, u = x @ up_w.T   -> (tm, tn), f32 accumulation on the MXU.
    g = lax.dot_general(x, wg_ref[...], contract_last,
                        preferred_element_type=jnp.float32)
    u = lax.dot_general(x, wu_ref[...], contract_last,
                        preferred_element_type=jnp.float32)

    # SwiGLU gate in f32 (sigmoid goes to the EUP slot, free while MXU streams).
    h = (g * jax.nn.sigmoid(g)) * u

    # Partial down projection: h_tile @ down_w[:, tile].T  -> (tm, dim), f32 accum.
    acc_ref[...] += lax.dot_general(h.astype(x.dtype), wd_ref[...], contract_last,
                                    preferred_element_type=jnp.float32)

    @pl.when(j == pl.num_programs(1) - 1)
    def _():
        o_ref[...] = acc_ref[...].astype(o_ref.dtype)


@functools.partial(jax.jit, static_argnames=("tm", "tn", "compute_dtype"))
def deepseek_mlp(x, wg, wu, wd, *, tm=256, tn=1024, compute_dtype=jnp.bfloat16):
    """Deepseek SwiGLU MLP.

    x:  [..., dim]
    wg: [moe_dim, dim]   gate_proj.weight (PyTorch [out, in] layout)
    wu: [moe_dim, dim]   up_proj.weight
    wd: [dim, moe_dim]   down_proj.weight
    Returns [..., dim] in x.dtype.  Matmuls run in `compute_dtype` with f32
    accumulation (set compute_dtype=jnp.float32 for full-precision).
    """
    orig_shape = x.shape
    out_dtype = x.dtype
    dim = orig_shape[-1]
    moe_dim = wg.shape[0]
    assert wg.shape == (moe_dim, dim) and wu.shape == (moe_dim, dim)
    assert wd.shape == (dim, moe_dim)

    x2 = x.reshape(-1, dim)
    tokens = x2.shape[0]

    # ---- tile-size selection -------------------------------------------------
    # Token tile: multiple of 8 (sublane), clamped so tiny inputs don't over-pad.
    tm_eff = max(8, min(int(tm), _round_up(tokens, 8)))
    tm_eff = _round_up(tm_eff, 8)
    tokens_padded = _round_up(tokens, tm_eff)

    # moe_dim tile: must divide moe_dim and be a multiple of 128 (lane axis of
    # the wd block) unless it is the full moe_dim.
    tn_eff = min(int(tn), moe_dim)
    if moe_dim % tn_eff != 0 or (tn_eff != moe_dim and tn_eff % 128 != 0):
        tn_eff = moe_dim

    # ---- dtype handling (no transposes; weights stay in [out, in] layout) -----
    cdt = jnp.dtype(compute_dtype)
    xc = x2.astype(cdt)
    wgc = wg.astype(cdt)
    wuc = wu.astype(cdt)
    wdc = wd.astype(cdt)
    if tokens_padded != tokens:
        xc = jnp.pad(xc, ((0, tokens_padded - tokens), (0, 0)))

    # ---- VMEM budget & cost estimate ------------------------------------------
    isz = cdt.itemsize
    osz = jnp.dtype(out_dtype).itemsize
    vmem_bytes = 2 * (tm_eff * dim * isz          # x (double-buffered)
                      + 2 * tn_eff * dim * isz    # wg + wu
                      + dim * tn_eff * isz        # wd
                      + tm_eff * dim * osz)       # output
    vmem_bytes += tm_eff * dim * 4                # f32 accumulator scratch
    vmem_bytes = min(int(vmem_bytes * 1.5) + (4 << 20), 100 * 1024 * 1024)

    cost = pl.CostEstimate(
        flops=6 * tokens * dim * moe_dim,
        transcendentals=tokens * moe_dim,
        bytes_accessed=(tokens * dim * (isz + osz)
                        + 3 * dim * moe_dim * isz),
    )

    grid = (tokens_padded // tm_eff, moe_dim // tn_eff)

    out2 = pl.pallas_call(
        _deepseek_mlp_kernel,
        out_shape=jax.ShapeDtypeStruct((tokens_padded, dim), out_dtype),
        grid_spec=pltpu.PrefetchScalarGridSpec(
            num_scalar_prefetch=0,
            grid=grid,
            in_specs=[
                pl.BlockSpec((tm_eff, dim), lambda i, j: (i, 0)),   # x tokens
                pl.BlockSpec((tn_eff, dim), lambda i, j: (j, 0)),   # gate W
                pl.BlockSpec((tn_eff, dim), lambda i, j: (j, 0)),   # up   W
                pl.BlockSpec((dim, tn_eff), lambda i, j: (0, j)),   # down W
            ],
            out_specs=pl.BlockSpec((tm_eff, dim), lambda i, j: (i, 0)),
            scratch_shapes=[pltpu.VMEM((tm_eff, dim), jnp.float32)],
        ),
        compiler_params=pltpu.CompilerParams(
            dimension_semantics=("parallel", "arbitrary"),
            vmem_limit_bytes=vmem_bytes,
        ),
        cost_estimate=cost,
    )(xc, wgc, wuc, wdc)

    if tokens_padded != tokens:
        out2 = out2[:tokens]
    return out2.reshape(orig_shape)


def _reference(x, wg, wu, wd, compute_dtype):
    """Pure-JAX reference with the same mixed-precision policy as the kernel."""
    cdt = jnp.dtype(compute_dtype)
    x2 = x.reshape(-1, x.shape[-1]).astype(cdt)
    g = jnp.dot(x2, wg.astype(cdt).T, preferred_element_type=jnp.float32)
    u = jnp.dot(x2, wu.astype(cdt).T, preferred_element_type=jnp.float32)
    h = (g * jax.nn.sigmoid(g)) * u
    o = jnp.dot(h.astype(cdt), wd.astype(cdt).T,
                preferred_element_type=jnp.float32)
    return o.astype(x.dtype).reshape(x.shape)


if __name__ == "__main__":
    # Small but layout-realistic shapes: tokens (2*40=80) not a multiple of the
    # tile (exercises padding), moe_dim=1024 with tn=512 (exercises the tiled
    # reduction / f32 accumulator path).
    dim, moe_dim = 256, 1024
    batch, seq = 2, 40

    key = jax.random.PRNGKey(0)
    kx, kg, ku, kd = jax.random.split(key, 4)

    x = jax.random.normal(kx, (batch, seq, dim), dtype=jnp.float32)
    wg = jax.random.normal(kg, (moe_dim, dim), dtype=jnp.float32) * 0.05
    wu = jax.random.normal(ku, (moe_dim, dim), dtype=jnp.float32) * 0.05
    wd = jax.random.normal(kd, (dim, moe_dim), dtype=jnp.float32) * 0.05

    # 1) Full-precision path: tight correctness check.
    out_f32 = deepseek_mlp(x, wg, wu, wd, tm=128, tn=512,
                           compute_dtype=jnp.float32)
    out_f32 = jax.block_until_ready(out_f32)
    ref_f32 = _reference(x, wg, wu, wd, jnp.float32)
    assert out_f32.shape == x.shape
    assert jnp.allclose(out_f32, ref_f32, atol=1e-4, rtol=1e-4), \
        "f32 mismatch vs reference"

    # 2) Default bf16 compute path (production config): looser, bf16-level check.
    out_bf16 = deepseek_mlp(x, wg, wu, wd, tm=256, tn=512)
    out_bf16 = jax.block_until_ready(out_bf16)
    ref_bf16 = _reference(x, wg, wu, wd, jnp.bfloat16)
    assert jnp.allclose(out_bf16, ref_bf16, atol=1.5e-2, rtol=1.5e-2), \
        "bf16 mismatch vs reference"

    print("KERNEL_OK")
</pallas_src>

<mosaic_0001>
module attributes {stable_mosaic.version = 11 : i64} {
  func.func @_deepseek_mlp_kernel(%arg0: i32, %arg1: i32, %arg2: memref<80x256xf32, #tpu.memory_space<vmem>>, %arg3: memref<512x256xf32, #tpu.memory_space<vmem>>, %arg4: memref<512x256xf32, #tpu.memory_space<vmem>>, %arg5: memref<256x512xf32, #tpu.memory_space<vmem>>, %arg6: memref<80x256xf32, #tpu.memory_space<vmem>>, %arg7: memref<80x256xf32, #tpu.memory_space<vmem>>) attributes {dimension_semantics = [#tpu.dimension_semantics<parallel>, #tpu.dimension_semantics<arbitrary>], iteration_bounds = array<i64: 1, 2>, scalar_prefetch = 0 : i64, scratch_operands = 1 : i64, tpu.core_type = #tpu.core_type<tc>, window_params = [{transform_indices = @transform_0, window_bounds = array<i64: 80, 256>}, {transform_indices = @transform_1, window_bounds = array<i64: 512, 256>}, {transform_indices = @transform_2, window_bounds = array<i64: 512, 256>}, {transform_indices = @transform_3, window_bounds = array<i64: 256, 512>}, {transform_indices = @transform_4, window_bounds = array<i64: 80, 256>}]} {
    %c0_i32 = arith.constant 0 : i32
    %0 = arith.cmpi eq, %arg1, %c0_i32 : i32
    %1 = arith.extui %0 : i1 to i32
    %c0_i32_0 = arith.constant 0 : i32
    %2 = arith.cmpi ne, %1, %c0_i32_0 : i32
    scf.if %2 {
      %cst_16 = arith.constant 0.000000e+00 : f32
      %23 = vector.broadcast %cst_16 : f32 to vector<80x256xf32>
      %c0_17 = arith.constant 0 : index
      %c0_18 = arith.constant 0 : index
      %24 = vector.load %arg7[%c0_17, %c0_18] : memref<80x256xf32, #tpu.memory_space<vmem>>, vector<80x256xf32>
      tpu.vector_store %arg7[%c0_17, %c0_18], %23 {strides = array<i32>} : memref<80x256xf32, #tpu.memory_space<vmem>>, vector<80x256xf32>,
    } else {
    }
    %c0 = arith.constant 0 : index
    %c0_1 = arith.constant 0 : index
    %3 = vector.load %arg2[%c0, %c0_1] : memref<80x256xf32, #tpu.memory_space<vmem>>, vector<80x256xf32>
    %c0_2 = arith.constant 0 : index
    %c0_3 = arith.constant 0 : index
    %4 = vector.load %arg3[%c0_2, %c0_3] : memref<512x256xf32, #tpu.memory_space<vmem>>, vector<512x256xf32>
    %cst = arith.constant dense<0.000000e+00> : vector<80x512xf32>
    %5 = tpu.matmul %3, %4, %cst {dimension_numbers = #tpu.dot_dimension_numbers<[1], [1], [0], [0], [0, 0, 1, 0], [], []>} : vector<80x256xf32>, vector<512x256xf32>, vector<80x512xf32> -> vector<80x512xf32>
    %c0_4 = arith.constant 0 : index
    %c0_5 = arith.constant 0 : index
    %6 = vector.load %arg4[%c0_4, %c0_5] : memref<512x256xf32, #tpu.memory_space<vmem>>, vector<512x256xf32>
    %cst_6 = arith.constant dense<0.000000e+00> : vector<80x512xf32>
    %7 = tpu.matmul %3, %6, %cst_6 {dimension_numbers = #tpu.dot_dimension_numbers<[1], [1], [0], [0], [0, 0, 1, 0], [], []>} : vector<80x256xf32>, vector<512x256xf32>, vector<80x512xf32> -> vector<80x512xf32>
    %8 = arith.negf %5 : vector<80x512xf32>
    %9 = math.exp %8 : vector<80x512xf32>
    %cst_7 = arith.constant 1.000000e+00 : f32
    %10 = vector.broadcast %cst_7 : f32 to vector<80x512xf32>
    %11 = arith.addf %10, %9 : vector<80x512xf32>
    %12 = arith.divf %10, %11 : vector<80x512xf32>
    %13 = arith.mulf %5, %12 : vector<80x512xf32>
    %14 = arith.mulf %13, %7 : vector<80x512xf32>
    %c0_8 = arith.constant 0 : index
    %c0_9 = arith.constant 0 : index
    %15 = vector.load %arg7[%c0_8, %c0_9] : memref<80x256xf32, #tpu.memory_space<vmem>>, vector<80x256xf32>
    %c0_10 = arith.constant 0 : index
    %c0_11 = arith.constant 0 : index
    %16 = vector.load %arg5[%c0_10, %c0_11] : memref<256x512xf32, #tpu.memory_space<vmem>>, vector<256x512xf32>
    %cst_12 = arith.constant dense<0.000000e+00> : vector<80x256xf32>
    %17 = tpu.matmul %14, %16, %cst_12 {dimension_numbers = #tpu.dot_dimension_numbers<[1], [1], [0], [0], [0, 0, 1, 0], [], []>} : vector<80x512xf32>, vector<256x512xf32>, vector<80x256xf32> -> vector<80x256xf32>
    %18 = arith.addf %15, %17 : vector<80x256xf32>
    %c0_13 = arith.constant 0 : index
    %c0_14 = arith.constant 0 : index
    %19 = vector.load %arg7[%c0_13, %c0_14] : memref<80x256xf32, #tpu.memory_space<vmem>>, vector<80x256xf32>
    tpu.vector_store %arg7[%c0_13, %c0_14], %18 {strides = array<i32>} : memref<80x256xf32, #tpu.memory_space<vmem>>, vector<80x256xf32>,
    %c1_i32 = arith.constant 1 : i32
    %20 = arith.cmpi eq, %arg1, %c1_i32 : i32
    %21 = arith.extui %20 : i1 to i32
    %c0_i32_15 = arith.constant 0 : i32
    %22 = arith.cmpi ne, %21, %c0_i32_15 : i32
    scf.if %22 {
      %c0_16 = arith.constant 0 : index
      %c0_17 = arith.constant 0 : index
      %23 = vector.load %arg7[%c0_16, %c0_17] : memref<80x256xf32, #tpu.memory_space<vmem>>, vector<80x256xf32>
      %c0_18 = arith.constant 0 : index
      %c0_19 = arith.constant 0 : index
      %24 = vector.load %arg6[%c0_18, %c0_19] : memref<80x256xf32, #tpu.memory_space<vmem>>, vector<80x256xf32>
      tpu.vector_store %arg6[%c0_18, %c0_19], %23 {strides = array<i32>} : memref<80x256xf32, #tpu.memory_space<vmem>>, vector<80x256xf32>,
    } else {
    }
    return
  }
  func.func @transform_0(%arg0: i32, %arg1: i32) -> (i32, i32) {
    %c0_i32 = arith.constant 0 : i32
    %c0_i32_0 = arith.constant 0 : i32
    return %arg0, %c0_i32 : i32, i32
  }
  func.func @transform_1(%arg0: i32, %arg1: i32) -> (i32, i32) {
    %c0_i32 = arith.constant 0 : i32
    %c0_i32_0 = arith.constant 0 : i32
    return %arg1, %c0_i32 : i32, i32
  }
  func.func @transform_2(%arg0: i32, %arg1: i32) -> (i32, i32) {
    %c0_i32 = arith.constant 0 : i32
    %c0_i32_0 = arith.constant 0 : i32
    return %arg1, %c0_i32 : i32, i32
  }
  func.func @transform_3(%arg0: i32, %arg1: i32) -> (i32, i32) {
    %c0_i32 = arith.constant 0 : i32
    %c0_i32_0 = arith.constant 0 : i32
    return %c0_i32, %arg1 : i32, i32
  }
  func.func @transform_4(%arg0: i32, %arg1: i32) -> (i32, i32) {
    %c0_i32 = arith.constant 0 : i32
    %c0_i32_0 = arith.constant 0 : i32
    return %arg0, %c0_i32 : i32, i32
  }
}

</mosaic_0001>

<bundles_post_ra>
// kernel: deepseek_mlp.1
= control target key start
LH: loop header
LB: loop body
LE: loop exit
PB: predicated region body
PF: predicated region fallthrough
CT: control target
= control target key end

     0   :  { %s4044_s0 = inlined_call_operand.hbm [shape: f32[80,256], index: 0, kind: input, shape index: {}]   ;;  %s4045_s1 = inlined_call_operand.hbm [shape: f32[1024,256], index: 1, kind: input, shape index: {}]   ;;  %s4046_s2 = inlined_call_operand.hbm [shape: f32[1024,256], index: 2, kind: input, shape index: {}]   ;;  %s4047_s3 = inlined_call_operand.hbm [shape: f32[256,1024], index: 3, kind: input, shape index: {}]   ;;  %s4048_s4 = inlined_call_operand.hbm [shape: f32[80,256], index: 4, kind: output, shape index: {}]  }
   0x1   :  { %4059 = sst [smem:[#allocation16_spill]] %s4045_s1 }
   0x2   :  { %4060 = sst [smem:[#allocation17_spill]] %s4046_s2 }
   0x3   :  { %9 = vsyncpa [#allocation4], 0 }
   0x4   :  { %10 = vsyncpa [#allocation7], 0 }
   0x5   :  { %12 = vsyncpa [#allocation7 + $0x1], 0 }
   0x6   :  { %13 = vsyncpa [#allocation10], 0 }
   0x7   :  { %15 = vsyncpa [#allocation10 + $0x1], 0 }
   0x8   :  { %16 = vsyncpa [#allocation5], 0  ;;  %s3054_s15 = smov 0   ;;  %s3056_s16 = smov 0  }
   0x9   :  { %s3058_s17 = smov 0   ;;  %s3060_s18 = smov 0  }
   0xa   :  { %s3062_s19 = smov 0   ;;  %s3064_s20 = smov 0  }
   0xb LB: > { %s31_s21 = sadd.s32 1, %s3010_s19  ;;  %s67_s22 = sadd.s32 1, %s3002_s17  ;;  %s3014_s20 = sphi %s3064_s20, %s22_s20   ;;  %s3010_s19 = sphi %s3062_s19, %s4082_s19   ;;  %s3006_s18 = sphi %s3060_s18, %s4081_s18   ;;  %s3002_s17 = sphi %s3058_s17, %s4080_s17   ;;  %s2998_s16 = sphi %s3056_s16, %s4079_s16   ;;  %s2994_s15 = sphi %s3054_s15, %s4078_s15  }
   0xc   : > { %p32_p0 = scmp.ge.s32.totalorder %s31_s21, 2  ;;  %p74_p1 = scmp.ne.s32.totalorder %s3002_s17, %s2998_s16 }
   0xd   : > { %p75_p2 = scmp.eq.s32.totalorder %s3014_s20, 0  ;;  %p2566_p5 = scmp.lt.s32.totalorder %s3014_s20, 2 }
   0xe   : > { %s4084_s21 = smov (%p32_p0, %s31_s21), 0  ;;  %s199_s25 = sand.u32 1, %s3014_s20  }
   0xf   : > { %p3091_p3 = por %p75_p2, %p74_p1  ;;  %s64_s24 = ssub.s32 %s3010_s19, %s4084_s21 }
  0x10   : > { %p65_p4 = scmp.eq.s32.totalorder %s64_s24, 0  ;;  %s4049_s26 = sand.u32 1, %s3002_s17  }
  0x11   : > { %s3105_s28 = sshll.u32 %s4049_s26, 10  ;;  %s2129_s29 = sshll.u32 %s3010_s19, 14 }
  0x12   : > { %s3101_s27 = scalar_select %p65_p4, %s3002_s17, %s67_s22  }
  0x13   : > { %s4062_s1 = sld [smem:[#allocation16_spill]]  ;;  %s203_s7 = scalar_lea.vmem [#allocation6], %s3105_s28 }
  0x14   : > { %s211_s8 = sshll.u32 %s203_s7, 4  ;;  %p3118_p6 = pnand %p2566_p5, %p3091_p3  ;;  %s3114_s8 = int_to_ptr.vmem [resolvable:$true] %s211_s8 }
  0x15   : > { %s4064_s2 = sld [smem:[#allocation17_spill]]  ;;  %s3127_s13 = scalar_lea.sflag [#allocation7], %s199_s25 }
  0x16   : > { %s4063_s9 = scalar_select %p3118_p6, 1, 0 }
  0x17   : > { %p3133_p8 = pneg %p3118_p6 }
  0x19   : > { %s3111_s6 = scalar_lea.hbm %s4062_s1, %s2129_s29  ;;  %s2813_s30 = scalar_lea.hbm %s4062_s1, 32768 }
  0x1a   : > { %s2808_s14 = scalar_lea.hbm %s3111_s6, 16384  ;;  %p2814_p11 = scmp.lt.u32.totalorder %s3111_s6, %s4062_s1 }
  0x1b   : > { %s3125_s12 = scalar_lea.hbm %s4064_s2, %s2129_s29  ;;  %p2809_p7 = scmp.ne.s32.totalorder %s3111_s6, %s2808_s14 }
  0x1c   : > { %s4065_s22 = scalar_select %p3133_p8, 1, 0 }
  0x1d   : > { %p2811_p9 = pnand %p3133_p8, %p2809_p7  ;;  %p2815_p12 = scmp.lt.u32.totalorder %s2813_s30, %s2808_s14 }
  0x1e   : > { %p2817_p0 = scmp.lt.u32.totalorder %s2808_s14, %s3111_s6 }
  0x1f   : > { %p2812_p10 = pneg %p2811_p9  ;;  %p2816_p13 = por %p2815_p12, %p2814_p11 }
  0x21   : > { %p2818_p1 = por %p2817_p0, %p2816_p13 }
  0x23   : > { %p2819_p2 = pnand %p2818_p1, %p2812_p10 }
  0x25   : > { %2822 = shalt.err (!%p2819_p2)
}
  0x26   : > { %s2823_s25 = scalar_lea.vmem %s3114_s8, 16384  ;;  %s3016_s7 = smov [#allocation6]  }
  0x27   : > { %p2824_p3 = scmp.ne.s32.totalorder %s3114_s8, %s2823_s25  ;;  %s2828_s10 = sshll.u32 %s3016_s7, 4  ;;  %s2829_s10 = int_to_ptr.vmem [resolvable:$false] %s2828_s10 }
  0x28   : > { %s2830_s11 = scalar_lea.vmem %s2829_s10, 32768  ;;  %p2831_p7 = scmp.lt.s32.totalorder %s3114_s8, %s2829_s10 }
  0x29   : > { %p2826_p4 = pnand %p2824_p3, %p3133_p8  ;;  %p2832_p9 = scmp.lt.s32.totalorder %s2830_s11, %s2823_s25 }
  0x2b   : > { %p2827_p5 = pneg %p2826_p4  ;;  %p2833_p11 = por %p2832_p9, %p2831_p7 }
  0x2d   : > { %p2834_p12 = pnand %p2833_p11, %p2827_p5 }
  0x2f   : > { %2837 = shalt.err (!%p2834_p12)
}
  0x30   : > { %s4050_s14 = smov 256   ;;  %s3018_s23 = smov 16  }
  0x31   : > { %2558 = dma.hbm_to_vmem [thread:$0]  (!%p3118_p6), %s3111_s6, 16384, %s3114_s8, %s3127_s13, %s4050_s14, %s4050_s14, %s3018_s23  }
  0x32   : > { %s3161_s24 = sadd.s32 4294967295, %s3014_s20   ;;  %p80_p10 = scmp.ne.s32.totalorder %s2998_s16, %s2994_s15 }
  0x33   : > { %p4052_p13 = scmp.eq.s32.totalorder %s3161_s24, 0  ;;  %p2063_p0 = scmp.ge.s32.totalorder %s3014_s20, 1 }
  0x34   : > { %p169_p1 = scmp.lt.s32.totalorder %s3014_s20, 3  ;;  %s3019_s8 = smov [#allocation3]  }
  0x35   : > { %p3170_p2 = por %p4052_p13, %p80_p10  ;;  %s185_s5 = sshll.u32 %s3019_s8, 4  ;;  %s3178_s5 = int_to_ptr.vmem [resolvable:$true] %s185_s5 }
  0x36   : > { %p3174_p3 = pnand %p2063_p0, %p169_p1  ;;  %s225_s15 = scalar_lea.vmem [#allocation8], %s3105_s28 }
  0x37   : > { %s4066_s30 = scalar_select %p3170_p2, 1, 0 }
  0x38   : > { %s4067_s6 = scalar_select %p3174_p3, 1, 0 }
  0x39   : > { %p2551_p4 = pneg %p3174_p3  ;;  %s233_s29 = sshll.u32 %s225_s15, 4  ;;  %s3183_s29 = int_to_ptr.vmem [resolvable:$true] %s233_s29 }
  0x3a   : > { %s2838_s7 = scalar_lea.hbm %s3125_s12, 16384  ;;  %s2843_s8 = scalar_lea.hbm %s4064_s2, 32768 }
  0x3b   : > { %p3187_p5 = pnand %p2551_p4, %p4052_p13  ;;  %p2839_p7 = scmp.ne.s32.totalorder %s3125_s12, %s2838_s7 }
  0x3c   : > { %p2844_p12 = scmp.lt.u32.totalorder %s3125_s12, %s4064_s2  ;;  %p2845_p10 = scmp.lt.u32.totalorder %s2843_s8, %s2838_s7 }
  0x3d   : > { %s4068_s25 = scalar_select %p3187_p5, 1, 0 }
  0x3e   : > { %p2841_p9 = pnand %p2839_p7, %p3133_p8  ;;  %p2846_p0 = por %p2845_p10, %p2844_p12 }
  0x3f   : > { %p2847_p1 = scmp.lt.u32.totalorder %s2838_s7, %s3125_s12 }
  0x40   : > { %p2842_p11 = pneg %p2841_p9 }
  0x41   : > { %p2848_p4 = por %p2847_p1, %p2846_p0 }
  0x43   : > { %p2849_p13 = pnand %p2848_p4, %p2842_p11 }
  0x45   : > { %2852 = shalt.err (!%p2849_p13)
}
  0x46   : > { %s2853_s15 = scalar_lea.vmem %s3183_s29, 16384  ;;  %s3020_s10 = smov [#allocation8]  }
  0x47   : > { %p2854_p7 = scmp.ne.s32.totalorder %s3183_s29, %s2853_s15  ;;  %s2858_s11 = sshll.u32 %s3020_s10, 4  ;;  %s2859_s11 = int_to_ptr.vmem [resolvable:$false] %s2858_s11 }
  0x48   : > { %s2860_s26 = scalar_lea.vmem %s2859_s11, 32768  ;;  %p2861_p3 = scmp.lt.s32.totalorder %s3183_s29, %s2859_s11 }
  0x49   : > { %p2856_p9 = pnand %p2854_p7, %p3133_p8  ;;  %p2862_p5 = scmp.lt.s32.totalorder %s2860_s26, %s2853_s15 }
  0x4b   : > { %p2857_p2 = pneg %p2856_p9  ;;  %p2863_p12 = por %p2862_p5, %p2861_p3 }
  0x4d   : > { %p2864_p10 = pnand %p2863_p12, %p2857_p2 }
  0x4f   : > { %2867 = shalt.err (!%p2864_p10)
}
  0x50   : > { %s4069_s14 = smov 256   ;;  %s2132_s7 = sshll.u32 %s3010_s19, 9 }
  0x51   : > { %2561 = dma.hbm_to_vmem [thread:$0]  (!%p3118_p6), %s3125_s12, 16384, %s3183_s29, %s3127_s13, %s4069_s14, %s4069_s14, %s3018_s23  }
  0x52   : > { %s2868_s11 = scalar_lea.hbm %s4044_s0, 2560  ;;  %p4070_p2 = scmp.ne.s32.totalorder %s4068_s25, 0 }
  0x53   : > { %p2869_p13 = scmp.ne.s32.totalorder %s4044_s0, %s2868_s11  ;;  %p2875_p0 = scmp.lt.u32.totalorder %s2868_s11, %s4044_s0 }
  0x54   : > { %p2870_p3 = pneg %p4070_p2 }
  0x56   : > { %p2871_p5 = pnand %p2870_p3, %p2869_p13 }
  0x58   : > { %p2872_p11 = pneg %p2871_p5 }
  0x5a   : > { %p2877_p1 = pnand %p2875_p0, %p2872_p11 }
  0x5c   : > { %2880 = shalt.err (!%p2877_p1)
}
  0x5d   : > { %s2881_s12 = scalar_lea.vmem %s3178_s5, 2560  ;;  %p2889_p12 = scmp.lt.s32.totalorder %s3178_s5, %s3178_s5 }
  0x5e   : > { %p2882_p4 = scmp.ne.s32.totalorder %s3178_s5, %s2881_s12  ;;  %p2890_p10 = scmp.lt.s32.totalorder %s2881_s12, %s2881_s12 }
  0x60   : > { %p2884_p7 = pnand %p2882_p4, %p2870_p3  ;;  %p2891_p6 = por %p2890_p10, %p2889_p12 }
  0x62   : > { %p2885_p9 = pneg %p2884_p7 }
  0x64   : > { %p2892_p8 = pnand %p2891_p6, %p2885_p9 }
  0x66   : > { %2895 = shalt.err (!%p2892_p8)
}
  0x67   : > { %2554 = dma.hbm_to_vmem [thread:$0]  (!%p4070_p2), %s4044_s0, 2560, %s3178_s5, [#allocation4], %s4069_s14, %s4069_s14, %s3018_s23  }
  0x68   : > { %s3244_s8 = scalar_lea.hbm %s4047_s3, %s2132_s7  ;;  %s247_s25 = scalar_lea.vmem [#allocation9], %s3105_s28 }
  0x69   : > { %s254_s10 = sshll.u32 %s247_s25, 4  ;;  %s4071_s11 = sand.u32 1, %s3002_s17   ;;  %s3247_s10 = int_to_ptr.vmem [resolvable:$true] %s254_s10 }
  0x6a   : > { %s3251_s15 = scalar_lea.sflag [#allocation10], %s4071_s11  ;;  %s2896_s26 = scalar_lea.hbm %s3244_s8, 16384 }
  0x6b   : > { %p2897_p6 = scmp.ne.s32.totalorder %s3244_s8, %s2896_s26  ;;  %p4072_p8 = scmp.ne.s32.totalorder %s4065_s22, 0 }
  0x6c   : > { %s2901_s14 = scalar_lea.hbm %s4047_s3, 32768  ;;  %p2902_p3 = scmp.lt.u32.totalorder %s3244_s8, %s4047_s3 }
  0x6d   : > { %p2899_p13 = pnand %p2897_p6, %p4072_p8  ;;  %p2903_p5 = scmp.lt.u32.totalorder %s2901_s14, %s2896_s26 }
  0x6e   : > { %p2905_p0 = scmp.lt.u32.totalorder %s2896_s26, %s3244_s8 }
  0x6f   : > { %p2900_p2 = pneg %p2899_p13  ;;  %p2904_p11 = por %p2903_p5, %p2902_p3 }
  0x71   : > { %p2906_p1 = por %p2905_p0, %p2904_p11 }
  0x73   : > { %p2907_p4 = pnand %p2906_p1, %p2900_p2 }
  0x75   : > { %2910 = shalt.err (!%p2907_p4)
}
  0x76   : > { %s2911_s28 = scalar_lea.vmem %s3247_s10, 16384  ;;  %s3021_s1 = smov [#allocation9]  }
  0x77   : > { %p2912_p7 = scmp.ne.s32.totalorder %s3247_s10, %s2911_s28  ;;  %s2916_s2 = sshll.u32 %s3021_s1, 4  ;;  %s2917_s2 = int_to_ptr.vmem [resolvable:$false] %s2916_s2 }
  0x78   : > { %s2918_s13 = scalar_lea.vmem %s2917_s2, 32768  ;;  %p2919_p10 = scmp.lt.s32.totalorder %s3247_s10, %s2917_s2 }
  0x79   : > { %p2914_p9 = pnand %p2912_p7, %p4072_p8  ;;  %p2920_p6 = scmp.lt.s32.totalorder %s2918_s13, %s2911_s28 }
  0x7b   : > { %p2915_p12 = pneg %p2914_p9  ;;  %p2921_p13 = por %p2920_p6, %p2919_p10 }
  0x7d   : > { %p2922_p3 = pnand %p2921_p13, %p2915_p12 }
  0x7f   : > { %2925 = shalt.err (!%p2922_p3)
}
  0x80   : > { %s3022_s29 = smov 1024   ;;  %s3023_s25 = smov 512  }
  0x81   : > { %s3024_s11 = smov 32   ;;  %p4073_p2 = scmp.ne.s32.totalorder %s4063_s9, 0 }
  0x82   : > { %p4074_p8 = scmp.ne.s32.totalorder %s4067_s6, 0 }
  0x83   : > { %2564 = dma.hbm_to_vmem [thread:$0]  (!%p4073_p2), %s3244_s8, 16384, %s3247_s10, %s3251_s15, %s3022_s29, %s3023_s25, %s3024_s11  }
  0x84   : > { %266 = sbr.rel (%p4074_p8) target bundleno = 1049 (0x419), region = 36  ;;  %p4075_p5 = scmp.eq.s32.totalorder (!%p4074_p8), %s3161_s24, 0 }
  0x8b   : > { %2977 = dma.done.wait (%p4075_p5), [#allocation4], 2560   ;;  %p4076_p11 = pmov %p4075_p5 }
  0x8c   : > { %s272_s22 = sand.u32 1, %s3161_s24   ;;  %s274_s26 = sand.u32 1, %s2998_s16  }
  0x8d   : > { %2979 = vsyncadd (%p4076_p11), [#allocation4], 4294964736  ;;  %s2079_s23 = sshll.u32 %s274_s26, 10  ;;  %s273_s5 = scalar_lea.sflag [#allocation7], %s272_s22 }
  0x8e   : > { %s3283_s14 = scalar_lea.vmem [#allocation6], %s2079_s23  ;;  %p4077_p0 = scmp.ne.s32.totalorder %s4066_s30, 0 }
  0x90   : > { %2981 = dma.done.wait (%p4077_p0), %s273_s5, 32768  }
  0x91   : > { %2983 = vsyncadd (%p4077_p0), %s273_s5, 4294934528  ;;  %s3289_s9 = scalar_lea.vmem [#allocation8], %s2079_s23  ;;  %s291_s6 = scalar_lea.sflag [#allocation10], %s274_s26 }
  0x92   : > { %s3291_s8 = scalar_lea.vmem [#allocation9], %s2079_s23 }
  0x93   : > { %2985 = dma.done.wait (%p4077_p0), %s291_s6, 16384  }
  0x94   : > { %2987 = vsyncadd (%p4077_p0), %s291_s6, 4294950912  ;;  %p2082_p1 = scmp.ne.s32.totalorder %s3006_s18, 0 }
  0x95   : > { %v3025_v0 = vmov (!%p2082_p1), 0.0  }
  0x96   : > { %332 = sbr.rel (%p2082_p1) target bundleno = 160 (0xa0), region = 56  ;;  %333 = vst [vmem:[#allocation2] sm:$0xff] (!%p2082_p1), %v3025_v0  ;;  %334 = vst [vmem:[#allocation2 + $0x8] sm:$0xff] (!%p2082_p1), %v3025_v0 }
  0x97   : > { %335 = vst [vmem:[#allocation2 + $0x10] sm:$0xff] (!%p2082_p1), %v3025_v0  ;;  %336 = vst [vmem:[#allocation2 + $0x18] sm:$0xff] (!%p2082_p1), %v3025_v0 }
  0x98   : > { %337 = vst [vmem:[#allocation2 + $0x20] sm:$0xff] (!%p2082_p1), %v3025_v0  ;;  %338 = vst [vmem:[#allocation2 + $0x28] sm:$0xff] (!%p2082_p1), %v3025_v0 }
  0x99   : > { %339 = vst [vmem:[#allocation2 + $0x30] sm:$0xff] (!%p2082_p1), %v3025_v0  ;;  %340 = vst [vmem:[#allocation2 + $0x38] sm:$0xff] (!%p2082_p1), %v3025_v0 }
  0x9a   : > { %341 = vst [vmem:[#allocation2 + $0x40] sm:$0xff] (!%p2082_p1), %v3025_v0  ;;  %342 = vst [vmem:[#allocation2 + $0x48] sm:$0xff] (!%p2082_p1), %v3025_v0 }
  0x9b   : > { %343 = vst [vmem:[#allocation2 + $0x50] sm:$0xff] (!%p2082_p1), %v3025_v0  ;;  %344 = vst [vmem:[#allocation2 + $0x58] sm:$0xff] (!%p2082_p1), %v3025_v0 }
  0x9c   : > { %345 = vst [vmem:[#allocation2 + $0x60] sm:$0xff] (!%p2082_p1), %v3025_v0  ;;  %346 = vst [vmem:[#allocation2 + $0x68] sm:$0xff] (!%p2082_p1), %v3025_v0 }
  0x9d   : > { %347 = vst [vmem:[#allocation2 + $0x70] sm:$0xff] %v3025_v0  ;;  %348 = vst [vmem:[#allocation2 + $0x78] sm:$0xff] %v3025_v0 }
  0x9e   : > { %349 = vst [vmem:[#allocation2 + $0x80] sm:$0xff] %v3025_v0  ;;  %350 = vst [vmem:[#allocation2 + $0x88] sm:$0xff] %v3025_v0 }
  0x9f   : > { %351 = vst [vmem:[#allocation2 + $0x90] sm:$0xff] %v3025_v0  ;;  %352 = vst [vmem:[#allocation2 + $0x98] sm:$0xff] %v3025_v0 }
  0xa0 PF: > { %v374_v1 = vld [vmem:[%s3283_s14 + $0x8] sm:$0xff]  ;;  %v376_v2 = vld [vmem:[%s3283_s14 + $0x18] sm:$0xff]  ;;  %v373_v3 = vld [vmem:[%s3283_s14] sm:$0xff]  ;;  %p2123_p4 = scmp.ne.s32.totalorder %s3006_s18, 1 }
  0xa1   : > { %v2133_v4 = vpack.c.bf16 %v376_v2, %v374_v1  ;;  %v375_v5 = vld [vmem:[%s3283_s14 + $0x10] sm:$0xff]  ;;  %v378_v6 = vld [vmem:[%s3283_s14 + $0x28] sm:$0xff]  ;;  %v380_v7 = vld [vmem:[%s3283_s14 + $0x38] sm:$0xff] }
  0xa2   : > { %v2135_v8 = vpack.c.bf16 %v375_v5, %v373_v3  ;;  %v2137_v9 = vpack.c.bf16 %v380_v7, %v378_v6  ;;  %v377_v10 = vld [vmem:[%s3283_s14 + $0x20] sm:$0xff]  ;;  %v379_v11 = vld [vmem:[%s3283_s14 + $0x30] sm:$0xff]  ;;  %v382_v12 = vld [vmem:[%s3283_s14 + $0x48] sm:$0xff] }
  0xa3   : > { %2134 = vmatprep.subr.bf16.mxu1 %v2133_v4  ;;  %v752_v13 = vld [vmem:[%s3289_s9 + $0x8] sm:$0xff]  ;;  %v754_v14 = vld [vmem:[%s3289_s9 + $0x18] sm:$0xff]  ;;  %v751_v17 = vld [vmem:[%s3289_s9] sm:$0xff]  ;;  %v2139_v20 = vpack.c.bf16 %v379_v11, %v377_v10 }
  0xa4   : > { %2136 = vmatpush1.bf16.xpose.msra.mxu1 %v2135_v8  ;;  %v384_v15 = vld [vmem:[%s3283_s14 + $0x58] sm:$0xff]  ;;  %v2261_v16 = vpack.c.bf16 %v754_v14, %v752_v13  ;;  %v753_v18 = vld [vmem:[%s3289_s9 + $0x10] sm:$0xff]  ;;  %v756_v21 = vld [vmem:[%s3289_s9 + $0x28] sm:$0xff] }
  0xa5   : > { %2138 = vmatprep.subr.bf16.mxu1 %v2137_v9  ;;  %v2263_v19 = vpack.c.bf16 %v753_v18, %v751_v17  ;;  %v758_v22 = vld [vmem:[%s3289_s9 + $0x38] sm:$0xff]  ;;  %v2141_v23 = vpack.c.bf16 %v384_v15, %v382_v12  ;;  %v755_v25 = vld [vmem:[%s3289_s9 + $0x20] sm:$0xff]  ;;  %v757_v26 = vld [vmem:[%s3289_s9 + $0x30] sm:$0xff] }
  0xa6   : > { %2262 = vmatprep.subr.bf16.mxu0 %v2261_v16  ;;  %v2265_v24 = vpack.c.bf16 %v758_v22, %v756_v21  ;;  %v760_v27 = vld [vmem:[%s3289_s9 + $0x48] sm:$0xff]  ;;  %v762_v28 = vld [vmem:[%s3289_s9 + $0x58] sm:$0xff]  ;;  %v381_v29 = vld [vmem:[%s3283_s14 + $0x40] sm:$0xff]  ;;  %v2267_v31 = vpack.c.bf16 %v757_v26, %v755_v25 }
  0xa7   : > { %2264 = vmatpush1.bf16.xpose.msra.mxu0 %v2263_v19  ;;  %v383_v30 = vld [vmem:[%s3283_s14 + $0x50] sm:$0xff]  ;;  %v386_v32 = vld [vmem:[%s3283_s14 + $0x68] sm:$0xff]  ;;  %v388_v33 = vld [vmem:[%s3283_s14 + $0x78] sm:$0xff]  ;;  %v2269_v34 = vpack.c.bf16 %v762_v28, %v760_v27 }
  0xa8   : > { %2266 = vmatprep.subr.bf16.mxu0 %v2265_v24  ;;  %v2143_v35 = vpack.c.bf16 %v383_v30, %v381_v29  ;;  %v2145_v36 = vpack.c.bf16 %v388_v33, %v386_v32  ;;  %v759_v37 = vld [vmem:[%s3289_s9 + $0x40] sm:$0xff]  ;;  %v761_v38 = vld [vmem:[%s3289_s9 + $0x50] sm:$0xff]  ;;  %v764_v39 = vld [vmem:[%s3289_s9 + $0x68] sm:$0xff] }
  0xa9   : > { %v766_v40 = vld [vmem:[%s3289_s9 + $0x78] sm:$0xff]  ;;  %v385_v41 = vld [vmem:[%s3283_s14 + $0x60] sm:$0xff]  ;;  %v387_v42 = vld [vmem:[%s3283_s14 + $0x70] sm:$0xff]  ;;  %v2271_v43 = vpack.c.bf16 %v761_v38, %v759_v37 }
  0xaa   : > { %v390_v44 = vld [vmem:[%s3283_s14 + $0x88] sm:$0xff]  ;;  %v392_v45 = vld [vmem:[%s3283_s14 + $0x98] sm:$0xff]  ;;  %v2273_v46 = vpack.c.bf16 %v766_v40, %v764_v39  ;;  %v2147_v47 = vpack.c.bf16 %v387_v42, %v385_v41  ;;  %v763_v49 = vld [vmem:[%s3289_s9 + $0x60] sm:$0xff] }
  0xab   : > { %v2149_v48 = vpack.c.bf16 %v392_v45, %v390_v44  ;;  %v765_v50 = vld [vmem:[%s3289_s9 + $0x70] sm:$0xff]  ;;  %v768_v51 = vld [vmem:[%s3289_s9 + $0x88] sm:$0xff]  ;;  %v770_v52 = vld [vmem:[%s3289_s9 + $0x98] sm:$0xff] }
  0xac   : > { %2140 = vmatpush1.bf16.xpose.msra.mxu1 %v2139_v20  ;;  %v389_v53 = vld [vmem:[%s3283_s14 + $0x80] sm:$0xff]  ;;  %v391_v54 = vld [vmem:[%s3283_s14 + $0x90] sm:$0xff]  ;;  %v2275_v55 = vpack.c.bf16 %v765_v50, %v763_v49  ;;  %v394_v56 = vld [vmem:[%s3283_s14 + $0xa8] sm:$0xff]  ;;  %v2277_v58 = vpack.c.bf16 %v770_v52, %v768_v51 }
  0xad   : > { %2142 = vmatprep.subr.bf16.mxu1 %v2141_v23  ;;  %v396_v57 = vld [vmem:[%s3283_s14 + $0xb8] sm:$0xff]  ;;  %v2151_v59 = vpack.c.bf16 %v391_v54, %v389_v53  ;;  %v767_v61 = vld [vmem:[%s3289_s9 + $0x80] sm:$0xff]  ;;  %v769_v62 = vld [vmem:[%s3289_s9 + $0x90] sm:$0xff] }
  0xae   : > { %v2153_v60 = vpack.c.bf16 %v396_v57, %v394_v56  ;;  %v772_v63 = vld [vmem:[%s3289_s9 + $0xa8] sm:$0xff]  ;;  %v774_v0 = vld [vmem:[%s3289_s9 + $0xb8] sm:$0xff]  ;;  %v393_v1 = vld [vmem:[%s3283_s14 + $0xa0] sm:$0xff]  ;;  %v2279_v3 = vpack.c.bf16 %v769_v62, %v767_v61 }
  0xaf   : > { %2268 = vmatpush1.bf16.xpose.msra.mxu0 %v2267_v31  ;;  %v395_v2 = vld [vmem:[%s3283_s14 + $0xb0] sm:$0xff]  ;;  %v398_v4 = vld [vmem:[%s3283_s14 + $0xc8] sm:$0xff]  ;;  %v400_v5 = vld [vmem:[%s3283_s14 + $0xd8] sm:$0xff]  ;;  %v2281_v6 = vpack.c.bf16 %v774_v0, %v772_v63 }
  0xb0   : > { %2270 = vmatprep.subr.bf16.mxu0 %v2269_v34  ;;  %v3346_v7 = vld [vmem:[#allocation3 + $0x8] sm:$0xff]  ;;  %v2155_v8 = vpack.c.bf16 %v395_v2, %v393_v1  ;;  %v2157_v9 = vpack.c.bf16 %v400_v5, %v398_v4  ;;  %v771_v10 = vld [vmem:[%s3289_s9 + $0xa0] sm:$0xff]  ;;  %v773_v11 = vld [vmem:[%s3289_s9 + $0xb0] sm:$0xff] }
  0xb1   : > { %565 = vmatprep.mubr.f32.mxu1 %v3346_v7  ;;  %943 = vmatprep.mubr.f32.mxu0 %v3346_v7  ;;  %v776_v12 = vld [vmem:[%s3289_s9 + $0xc8] sm:$0xff]  ;;  %v778_v13 = vld [vmem:[%s3289_s9 + $0xd8] sm:$0xff]  ;;  %v397_v14 = vld [vmem:[%s3283_s14 + $0xc0] sm:$0xff]  ;;  %v2283_v16 = vpack.c.bf16 %v773_v11, %v771_v10 }
  0xb2   : > { %v399_v15 = vld [vmem:[%s3283_s14 + $0xd0] sm:$0xff]  ;;  %v402_v17 = vld [vmem:[%s3283_s14 + $0xe8] sm:$0xff]  ;;  %v404_v18 = vld [vmem:[%s3283_s14 + $0xf8] sm:$0xff]  ;;  %v2285_v19 = vpack.c.bf16 %v778_v13, %v776_v12 }
  0xb3   : > { %v2159_v20 = vpack.c.bf16 %v399_v15, %v397_v14  ;;  %v2161_v21 = vpack.c.bf16 %v404_v18, %v402_v17  ;;  %v775_v22 = vld [vmem:[%s3289_s9 + $0xc0] sm:$0xff]  ;;  %v777_v23 = vld [vmem:[%s3289_s9 + $0xd0] sm:$0xff]  ;;  %v780_v24 = vld [vmem:[%s3289_s9 + $0xe8] sm:$0xff] }
  0xb4   : > { %2144 = vmatpush1.bf16.xpose.msra.mxu1 %v2143_v35  ;;  %v782_v25 = vld [vmem:[%s3289_s9 + $0xf8] sm:$0xff]  ;;  %v401_v26 = vld [vmem:[%s3283_s14 + $0xe0] sm:$0xff]  ;;  %v403_v27 = vld [vmem:[%s3283_s14 + $0xf0] sm:$0xff]  ;;  %v2287_v28 = vpack.c.bf16 %v777_v23, %v775_v22 }
  0xb5   : > { %2146 = vmatprep.subr.bf16.mxu1 %v2145_v36  ;;  %v406_v29 = vld [vmem:[%s3283_s14 + $0x108] sm:$0xff]  ;;  %v408_v30 = vld [vmem:[%s3283_s14 + $0x118] sm:$0xff]  ;;  %v2289_v31 = vpack.c.bf16 %v782_v25, %v780_v24  ;;  %v2163_v32 = vpack.c.bf16 %v403_v27, %v401_v26  ;;  %v779_v34 = vld [vmem:[%s3289_s9 + $0xe0] sm:$0xff] }
  0xb6   : > { %v2165_v33 = vpack.c.bf16 %v408_v30, %v406_v29  ;;  %v781_v35 = vld [vmem:[%s3289_s9 + $0xf0] sm:$0xff]  ;;  %v784_v36 = vld [vmem:[%s3289_s9 + $0x108] sm:$0xff]  ;;  %v786_v37 = vld [vmem:[%s3289_s9 + $0x118] sm:$0xff] }
  0xb7   : > { %2272 = vmatpush1.bf16.xpose.msra.mxu0 %v2271_v43  ;;  %v405_v38 = vld [vmem:[%s3283_s14 + $0x100] sm:$0xff]  ;;  %v407_v39 = vld [vmem:[%s3283_s14 + $0x110] sm:$0xff]  ;;  %v2291_v40 = vpack.c.bf16 %v781_v35, %v779_v34  ;;  %v410_v41 = vld [vmem:[%s3283_s14 + $0x128] sm:$0xff]  ;;  %v2293_v43 = vpack.c.bf16 %v786_v37, %v784_v36 }
  0xb8   : > { %2274 = vmatprep.subr.bf16.mxu0 %v2273_v46  ;;  %v412_v42 = vld [vmem:[%s3283_s14 + $0x138] sm:$0xff]  ;;  %v2167_v44 = vpack.c.bf16 %v407_v39, %v405_v38  ;;  %v783_v46 = vld [vmem:[%s3289_s9 + $0x100] sm:$0xff]  ;;  %v411_v51 = vld [vmem:[%s3283_s14 + $0x130] sm:$0xff] }
  0xb9   : > { %v2169_v45 = vpack.c.bf16 %v412_v42, %v410_v41  ;;  %v790_v49 = vld [vmem:[%s3289_s9 + $0x138] sm:$0xff]  ;;  %v409_v50 = vld [vmem:[%s3283_s14 + $0x120] sm:$0xff]  ;;  %v414_v53 = vld [vmem:[%s3283_s14 + $0x148] sm:$0xff] }
  0xba   : > { %v416_v54 = vld [vmem:[%s3283_s14 + $0x158] sm:$0xff]  ;;  %v2171_v56 = vpack.c.bf16 %v411_v51, %v409_v50  ;;  %v413_v62 = vld [vmem:[%s3283_s14 + $0x140] sm:$0xff]  ;;  %v415_v63 = vld [vmem:[%s3283_s14 + $0x150] sm:$0xff] }
  0xbb   : > { %v2173_v57 = vpack.c.bf16 %v416_v54, %v414_v53  ;;  %v794_v61 = vld [vmem:[%s3289_s9 + $0x158] sm:$0xff]  ;;  %v418_v1 = vld [vmem:[%s3283_s14 + $0x168] sm:$0xff]  ;;  %v2175_v4 = vpack.c.bf16 %v415_v63, %v413_v62  ;;  %v417_v11 = vld [vmem:[%s3283_s14 + $0x160] sm:$0xff] }
  0xbc   : > { %2148 = vmatpush1.bf16.xpose.msra.mxu1 %v2147_v47  ;;  %v785_v47 = vld [vmem:[%s3289_s9 + $0x110] sm:$0xff]  ;;  %v420_v2 = vld [vmem:[%s3283_s14 + $0x178] sm:$0xff]  ;;  %v422_v14 = vld [vmem:[%s3283_s14 + $0x188] sm:$0xff] }
  0xbd   : > { %2150 = vmatprep.subr.bf16.mxu1 %v2149_v48  ;;  %v788_v48 = vld [vmem:[%s3289_s9 + $0x128] sm:$0xff]  ;;  %v2295_v52 = vpack.c.bf16 %v785_v47, %v783_v46  ;;  %v2177_v5 = vpack.c.bf16 %v420_v2, %v418_v1  ;;  %v798_v10 = vld [vmem:[%s3289_s9 + $0x178] sm:$0xff]  ;;  %v419_v12 = vld [vmem:[%s3283_s14 + $0x170] sm:$0xff] }
  0xbe   : > { %v424_v15 = vld [vmem:[%s3283_s14 + $0x198] sm:$0xff]  ;;  %v2179_v17 = vpack.c.bf16 %v419_v12, %v417_v11  ;;  %v421_v23 = vld [vmem:[%s3283_s14 + $0x180] sm:$0xff]  ;;  %v423_v24 = vld [vmem:[%s3283_s14 + $0x190] sm:$0xff] }
  0xbf   : > { %2276 = vmatpush1.bf16.xpose.msra.mxu0 %v2275_v55  ;;  %v2297_v55 = vpack.c.bf16 %v790_v49, %v788_v48  ;;  %v2181_v18 = vpack.c.bf16 %v424_v15, %v422_v14  ;;  %v802_v22 = vld [vmem:[%s3289_s9 + $0x198] sm:$0xff]  ;;  %v426_v26 = vld [vmem:[%s3283_s14 + $0x1a8] sm:$0xff]  ;;  %v2183_v29 = vpack.c.bf16 %v423_v24, %v421_v23  ;;  %v425_v35 = vld [vmem:[%s3283_s14 + $0x1a0] sm:$0xff] }
  0xc0   : > { %2278 = vmatprep.subr.bf16.mxu0 %v2277_v58  ;;  %v787_v58 = vld [vmem:[%s3289_s9 + $0x120] sm:$0xff]  ;;  %v428_v27 = vld [vmem:[%s3283_s14 + $0x1b8] sm:$0xff]  ;;  %v427_v36 = vld [vmem:[%s3283_s14 + $0x1b0] sm:$0xff] }
  0xc1   : > { %v2185_v30 = vpack.c.bf16 %v428_v27, %v426_v26  ;;  %v806_v34 = vld [vmem:[%s3289_s9 + $0x1b8] sm:$0xff]  ;;  %v430_v38 = vld [vmem:[%s3283_s14 + $0x1c8] sm:$0xff]  ;;  %v2187_v41 = vpack.c.bf16 %v427_v36, %v425_v35  ;;  %v429_v47 = vld [vmem:[%s3283_s14 + $0x1c0] sm:$0xff] }
  0xc2   : > { %v432_v39 = vld [vmem:[%s3283_s14 + $0x1d8] sm:$0xff]  ;;  %v431_v48 = vld [vmem:[%s3283_s14 + $0x1d0] sm:$0xff]  ;;  %v434_v50 = vld [vmem:[%s3283_s14 + $0x1e8] sm:$0xff] }
  0xc3   : > { %v2189_v42 = vpack.c.bf16 %v432_v39, %v430_v38  ;;  %v810_v46 = vld [vmem:[%s3289_s9 + $0x1d8] sm:$0xff]  ;;  %v2191_v53 = vpack.c.bf16 %v431_v48, %v429_v47  ;;  %v438_v62 = vld [vmem:[%s3283_s14 + $0x208] sm:$0xff]  ;;  %v3438_v14 = vld [vmem:[#allocation3] sm:$0xff] }
  0xc4   : > { %2152 = vmatpush1.bf16.xpose.msra.mxu1 %v2151_v59  ;;  %v789_v59 = vld [vmem:[%s3289_s9 + $0x130] sm:$0xff]  ;;  %v436_v51 = vld [vmem:[%s3283_s14 + $0x1f8] sm:$0xff]  ;;  %v442_v11 = vld [vmem:[%s3283_s14 + $0x228] sm:$0xff] }
  0xc5   : > { %2154 = vmatprep.subr.bf16.mxu1 %v2153_v60  ;;  %v792_v60 = vld [vmem:[%s3289_s9 + $0x148] sm:$0xff]  ;;  %v2299_v0 = vpack.c.bf16 %v789_v59, %v787_v58  ;;  %v2193_v54 = vpack.c.bf16 %v436_v51, %v434_v50  ;;  %v814_v58 = vld [vmem:[%s3289_s9 + $0x1f8] sm:$0xff]  ;;  %v433_v59 = vld [vmem:[%s3283_s14 + $0x1e0] sm:$0xff] }
  0xc6   : > { %v440_v63 = vld [vmem:[%s3283_s14 + $0x218] sm:$0xff]  ;;  %v441_v23 = vld [vmem:[%s3283_s14 + $0x220] sm:$0xff]  ;;  %v443_v24 = vld [vmem:[%s3283_s14 + $0x230] sm:$0xff] }
  0xc7   : > { %2280 = vmatpush1.bf16.xpose.msra.mxu0 %v2279_v3  ;;  %v2301_v3 = vpack.c.bf16 %v794_v61, %v792_v60  ;;  %v435_v60 = vld [vmem:[%s3283_s14 + $0x1f0] sm:$0xff]  ;;  %v2197_v2 = vpack.c.bf16 %v440_v63, %v438_v62  ;;  %v444_v12 = vld [vmem:[%s3283_s14 + $0x238] sm:$0xff]  ;;  %v446_v27 = vld [vmem:[%s3283_s14 + $0x248] sm:$0xff] }
  0xc8   : > { %2282 = vmatprep.subr.bf16.mxu0 %v2281_v6  ;;  %v791_v6 = vld [vmem:[%s3289_s9 + $0x140] sm:$0xff]  ;;  %v2195_v1 = vpack.c.bf16 %v435_v60, %v433_v59  ;;  %v3468_v36 = vld [vmem:[#allocation3 + $0x30] sm:$0xff]  ;;  %v1490_v38 = vld [vmem:[%s3291_s8 + $0xa8] sm:$0xff] }
  0xc9   : > { %v1481_v35 = vld [vmem:[%s3291_s8 + $0x60] sm:$0xff]  ;;  %v456_v59 = vld [vmem:[%s3283_s14 + $0x298] sm:$0xff] }
  0xca   : > { %v445_v39 = vld [vmem:[%s3283_s14 + $0x240] sm:$0xff] }
  0xcb   : > { %v3482_v47 = vld [vmem:[#allocation3 + $0x40] sm:$0xff] }
  0xcc   : > { %2156 = vmatpush1.bf16.xpose.msra.mxu1 %v2155_v8  ;;  %v793_v8 = vld [vmem:[%s3289_s9 + $0x150] sm:$0xff]  ;;  %v1485_v50 = vld [vmem:[%s3291_s8 + $0x80] sm:$0xff] }
  0xcd   : > { %2158 = vmatprep.subr.bf16.mxu1 %v2157_v9  ;;  %v796_v9 = vld [vmem:[%s3289_s9 + $0x168] sm:$0xff]  ;;  %v2303_v13 = vpack.c.bf16 %v793_v8, %v791_v6  ;;  %v437_v8 = vld [vmem:[%s3283_s14 + $0x200] sm:$0xff] }
  0xce   : > { %v1474_v6 = vld [vmem:[%s3291_s8 + $0x28] sm:$0xff]  ;;  %v1489_v51 = vld [vmem:[%s3291_s8 + $0xa0] sm:$0xff] }
  0xcf   : > { %2284 = vmatpush1.bf16.xpose.msra.mxu0 %v2283_v16  ;;  %v2305_v16 = vpack.c.bf16 %v798_v10, %v796_v9  ;;  %v439_v9 = vld [vmem:[%s3283_s14 + $0x210] sm:$0xff]  ;;  %v2399_v60 = vpack.c.bf16 %v1489_v51, %v1485_v50  ;;  %v3506_v63 = vld [vmem:[#allocation3 + $0x60] sm:$0xff] }
  0xd0   : > { %2286 = vmatprep.subr.bf16.mxu0 %v2285_v19  ;;  %v795_v19 = vld [vmem:[%s3289_s9 + $0x160] sm:$0xff]  ;;  %v2199_v15 = vpack.c.bf16 %v439_v9, %v437_v8  ;;  %v455_v9 = vld [vmem:[%s3283_s14 + $0x290] sm:$0xff] }
  0xd1   : > { %v453_v8 = vld [vmem:[%s3283_s14 + $0x280] sm:$0xff] }
  0xd4   : > { %2160 = vmatpush1.bf16.xpose.msra.mxu1 %v2159_v20  ;;  %v797_v20 = vld [vmem:[%s3289_s9 + $0x170] sm:$0xff] }
  0xd5   : > { %2162 = vmatprep.subr.bf16.mxu1 %v2161_v21  ;;  %v800_v21 = vld [vmem:[%s3289_s9 + $0x188] sm:$0xff]  ;;  %v2307_v25 = vpack.c.bf16 %v797_v20, %v795_v19  ;;  %v1473_v19 = vld [vmem:[%s3291_s8 + $0x20] sm:$0xff] }
  0xd6   : > { %v1478_v20 = vld [vmem:[%s3291_s8 + $0x48] sm:$0xff] }
  0xd7   : > { %2288 = vmatpush1.bf16.xpose.msra.mxu0 %v2287_v28  ;;  %v2309_v28 = vpack.c.bf16 %v802_v22, %v800_v21  ;;  %v1482_v21 = vld [vmem:[%s3291_s8 + $0x68] sm:$0xff]  ;;  %v3448_v22 = vld [vmem:[#allocation3 + $0x10] sm:$0xff] }
  0xd8   : > { %2290 = vmatprep.subr.bf16.mxu0 %v2289_v31  ;;  %v799_v31 = vld [vmem:[%s3289_s9 + $0x180] sm:$0xff] }
  0xdc   : > { %2164 = vmatpush1.bf16.xpose.msra.mxu1 %v2163_v32  ;;  %v801_v32 = vld [vmem:[%s3289_s9 + $0x190] sm:$0xff] }
  0xdd   : > { %2166 = vmatprep.subr.bf16.mxu1 %v2165_v33  ;;  %v804_v33 = vld [vmem:[%s3289_s9 + $0x1a8] sm:$0xff]  ;;  %v2311_v37 = vpack.c.bf16 %v801_v32, %v799_v31  ;;  %v3459_v31 = vld [vmem:[#allocation3 + $0x20] sm:$0xff] }
  0xdf   : > { %2292 = vmatpush1.bf16.xpose.msra.mxu0 %v2291_v40  ;;  %v2313_v40 = vpack.c.bf16 %v806_v34, %v804_v33  ;;  %v3461_v33 = vld [vmem:[#allocation3 + $0x38] sm:$0xff]  ;;  %v1477_v34 = vld [vmem:[%s3291_s8 + $0x40] sm:$0xff] }
  0xe0   : > { %2294 = vmatprep.subr.bf16.mxu0 %v2293_v43  ;;  %v803_v43 = vld [vmem:[%s3289_s9 + $0x1a0] sm:$0xff] }
  0xe4   : > { %2168 = vmatpush1.bf16.xpose.msra.mxu1 %v2167_v44  ;;  %v805_v44 = vld [vmem:[%s3289_s9 + $0x1b0] sm:$0xff] }
  0xe5   : > { %2170 = vmatprep.subr.bf16.mxu1 %v2169_v45  ;;  %v808_v45 = vld [vmem:[%s3289_s9 + $0x1c8] sm:$0xff]  ;;  %v2315_v49 = vpack.c.bf16 %v805_v44, %v803_v43  ;;  %v452_v43 = vld [vmem:[%s3283_s14 + $0x278] sm:$0xff]  ;;  %v2395_v44 = vpack.c.bf16 %v1481_v35, %v1477_v34 }
  0xe7   : > { %2296 = vmatpush1.bf16.xpose.msra.mxu0 %v2295_v52  ;;  %v2317_v52 = vpack.c.bf16 %v810_v46, %v808_v45 }
  0xe8   : > { %2298 = vmatprep.subr.bf16.mxu0 %v2297_v55  ;;  %v807_v55 = vld [vmem:[%s3289_s9 + $0x1c0] sm:$0xff] }
  0xec   : > { %2172 = vmatpush1.bf16.xpose.msra.mxu1 %v2171_v56  ;;  %v809_v56 = vld [vmem:[%s3289_s9 + $0x1d0] sm:$0xff] }
  0xed   : > { %2174 = vmatprep.subr.bf16.mxu1 %v2173_v57  ;;  %v812_v57 = vld [vmem:[%s3289_s9 + $0x1e8] sm:$0xff]  ;;  %v2319_v61 = vpack.c.bf16 %v809_v56, %v807_v55  ;;  %v449_v55 = vld [vmem:[%s3283_s14 + $0x260] sm:$0xff]  ;;  %v451_v56 = vld [vmem:[%s3283_s14 + $0x270] sm:$0xff] }
  0xee   : > { %v2211_v62 = vpack.c.bf16 %v451_v56, %v449_v55  ;;  %v1521_v55 = vld [vmem:[%s3291_s8 + $0x1a0] sm:$0xff]  ;;  %v1526_v56 = vld [vmem:[%s3291_s8 + $0x1c8] sm:$0xff] }
  0xef   : > { %2300 = vmatpush1.bf16.xpose.msra.mxu0 %v2299_v0  ;;  %v2321_v0 = vpack.c.bf16 %v814_v58, %v812_v57  ;;  %v3498_v57 = vld [vmem:[#allocation3 + $0x68] sm:$0xff] }
  0xf0   : > { %2302 = vmatprep.subr.bf16.mxu0 %v2301_v3  ;;  %v811_v3 = vld [vmem:[%s3289_s9 + $0x1e0] sm:$0xff]  ;;  %v454_v58 = vld [vmem:[%s3283_s14 + $0x288] sm:$0xff] }
  0xf4   : > { %2176 = vmatpush1.bf16.xpose.msra.mxu1 %v2175_v4  ;;  %v813_v4 = vld [vmem:[%s3289_s9 + $0x1f0] sm:$0xff] }
  0xf5   : > { %2178 = vmatprep.subr.bf16.mxu1 %v2177_v5  ;;  %v1470_v5 = vld [vmem:[%s3291_s8 + $0x8] sm:$0xff]  ;;  %v2323_v10 = vpack.c.bf16 %v813_v4, %v811_v3  ;;  %v1497_v3 = vld [vmem:[%s3291_s8 + $0xe0] sm:$0xff]  ;;  %v3516_v4 = vld [vmem:[#allocation3 + $0x70] sm:$0xff] }
  0xf7   : > { %2304 = vmatpush1.bf16.xpose.msra.mxu0 %v2303_v13  ;;  %v2389_v13 = vpack.c.bf16 %v1474_v6, %v1470_v5  ;;  %v1502_v5 = vld [vmem:[%s3291_s8 + $0x108] sm:$0xff] }
  0xf8   : > { %2306 = vmatprep.subr.bf16.mxu0 %v2305_v16  ;;  %v2201_v16 = vpack.c.bf16 %v444_v12, %v442_v11  ;;  %v1506_v6 = vld [vmem:[%s3291_s8 + $0x128] sm:$0xff]  ;;  %v460_v12 = vld [vmem:[%s3283_s14 + $0x2b8] sm:$0xff] }
  0xf9   : > { %v458_v11 = vld [vmem:[%s3283_s14 + $0x2a8] sm:$0xff] }
  0xfc   : > { %2180 = vmatpush1.bf16.xpose.msra.mxu1 %v2179_v17  ;;  %v3440_v17 = vld [vmem:[#allocation3 + $0x18] sm:$0xff] }
  0xfd   : > { %2182 = vmatprep.subr.bf16.mxu1 %v2181_v18  ;;  %v1469_v18 = vld [vmem:[%s3291_s8] sm:$0xff] }
  0xfe   : > { %v2391_v26 = vpack.c.bf16 %v1473_v19, %v1469_v18  ;;  %v3530_v18 = vld [vmem:[#allocation3 + $0x80] sm:$0xff]  ;;  %v2217_v19 = vpack.c.bf16 %v460_v12, %v458_v11  ;;  %v1538_v11 = vld [vmem:[%s3291_s8 + $0x228] sm:$0xff] }
  0xff   : > { %2308 = vmatpush1.bf16.xpose.msra.mxu0 %v2307_v25  ;;  %v3452_v25 = vld [vmem:[#allocation3 + $0x28] sm:$0xff]  ;;  %v469_v12 = vld [vmem:[%s3283_s14 + $0x300] sm:$0xff] }
 0x100   : > { %2310 = vmatprep.subr.bf16.mxu0 %v2309_v28  ;;  %v448_v28 = vld [vmem:[%s3283_s14 + $0x258] sm:$0xff] }
 0x101   : > { %v2205_v32 = vpack.c.bf16 %v448_v28, %v446_v27  ;;  %v1514_v27 = vld [vmem:[%s3291_s8 + $0x168] sm:$0xff]  ;;  %v457_v28 = vld [vmem:[%s3283_s14 + $0x2a0] sm:$0xff] }
 0x104   : > { %2184 = vmatpush1.bf16.xpose.msra.mxu1 %v2183_v29  ;;  %v2393_v29 = vpack.c.bf16 %v1482_v21, %v1478_v20  ;;  %v3532_v20 = vld [vmem:[#allocation3 + $0x98] sm:$0xff]  ;;  %v1501_v21 = vld [vmem:[%s3291_s8 + $0x100] sm:$0xff] }
 0x105   : > { %2186 = vmatprep.subr.bf16.mxu1 %v2185_v30  ;;  %v2203_v30 = vpack.c.bf16 %v443_v24, %v441_v23  ;;  %v1505_v23 = vld [vmem:[%s3291_s8 + $0x120] sm:$0xff]  ;;  %v3540_v24 = vld [vmem:[#allocation3 + $0x90] sm:$0xff] }
 0x106   : > { %v2407_v34 = vpack.c.bf16 %v1505_v23, %v1501_v21 }
 0x107   : > { %2312 = vmatpush1.bf16.xpose.msra.mxu0 %v2311_v37  ;;  %v1486_v37 = vld [vmem:[%s3291_s8 + $0x88] sm:$0xff] }
 0x108   : > { %2314 = vmatprep.subr.bf16.mxu0 %v2313_v40  ;;  %v447_v40 = vld [vmem:[%s3283_s14 + $0x250] sm:$0xff]  ;;  %v2397_v45 = vpack.c.bf16 %v1490_v38, %v1486_v37 }
 0x109   : > { %v2207_v46 = vpack.c.bf16 %v447_v40, %v445_v39  ;;  %v1509_v39 = vld [vmem:[%s3291_s8 + $0x140] sm:$0xff] }
 0x10a   : > { %v1513_v40 = vld [vmem:[%s3291_s8 + $0x160] sm:$0xff] }
 0x10c   : > { %2188 = vmatpush1.bf16.xpose.msra.mxu1 %v2187_v41  ;;  %v3474_v41 = vld [vmem:[#allocation3 + $0x48] sm:$0xff] }
 0x10d   : > { %2190 = vmatprep.subr.bf16.mxu1 %v2189_v42  ;;  %v450_v42 = vld [vmem:[%s3283_s14 + $0x268] sm:$0xff] }
 0x10e   : > { %v2209_v48 = vpack.c.bf16 %v452_v43, %v450_v42  ;;  %v1518_v42 = vld [vmem:[%s3291_s8 + $0x188] sm:$0xff] }
 0x10f   : > { %2316 = vmatpush1.bf16.xpose.msra.mxu0 %v2315_v49  ;;  %v3484_v49 = vld [vmem:[#allocation3 + $0x58] sm:$0xff]  ;;  %v1522_v43 = vld [vmem:[%s3291_s8 + $0x1a8] sm:$0xff] }
 0x110   : > { %2318 = vmatprep.subr.bf16.mxu0 %v2317_v52  ;;  %v3492_v52 = vld [vmem:[#allocation3 + $0x50] sm:$0xff]  ;;  %v2413_v50 = vpack.c.bf16 %v1522_v43, %v1518_v42  ;;  %v1541_v43 = vld [vmem:[%s3291_s8 + $0x240] sm:$0xff] }
 0x114   : > { %2192 = vmatpush1.bf16.xpose.msra.mxu1 %v2191_v53  ;;  %v1494_v53 = vld [vmem:[%s3291_s8 + $0xc8] sm:$0xff] }
 0x115   : > { %2194 = vmatprep.subr.bf16.mxu1 %v2193_v54  ;;  %v1498_v54 = vld [vmem:[%s3291_s8 + $0xe8] sm:$0xff] }
 0x117   : > { %2320 = vmatpush1.bf16.xpose.msra.mxu0 %v2319_v61  ;;  %v2401_v61 = vpack.c.bf16 %v1498_v54, %v1494_v53  ;;  %v1517_v54 = vld [vmem:[%s3291_s8 + $0x180] sm:$0xff] }
 0x118   : > { %2322 = vmatprep.subr.bf16.mxu0 %v2321_v0  ;;  %v2213_v0 = vpack.c.bf16 %v456_v59, %v454_v58  ;;  %v1530_v58 = vld [vmem:[%s3291_s8 + $0x1e8] sm:$0xff]  ;;  %v465_v59 = vld [vmem:[%s3283_s14 + $0x2e0] sm:$0xff] }
 0x11c   : > { %2196 = vmatpush1.bf16.xpose.msra.mxu1 %v2195_v1  ;;  %v3508_v1 = vld [vmem:[#allocation3 + $0x78] sm:$0xff] }
 0x11d   : > { %2198 = vmatprep.subr.bf16.mxu1 %v2197_v2  ;;  %v1493_v2 = vld [vmem:[%s3291_s8 + $0xc0] sm:$0xff] }
 0x11f   : > { %2324 = vmatpush1.bf16.xpose.msra.mxu0 %v2323_v10  ;;  %v3522_v10 = vld [vmem:[#allocation3 + $0x88] sm:$0xff] }
 0x120   : > { %2390 = vmatprep.subr.bf16.mxu0 %v2389_v13  ;;  %v2403_v13 = vpack.c.bf16 %v1497_v3, %v1493_v2  ;;  %v2417_v2 = vpack.c.bf16 %v1530_v58, %v1526_v56  ;;  %v1549_v58 = vld [vmem:[%s3291_s8 + $0x280] sm:$0xff] }
 0x123   : > { %566 = vmatmul.mubr.f32.vlgmr.msra.gmra.mrb[0].mxu1 %v3438_v14 }
 0x124   : > { %2200 = vmatpush1.bf16.xpose.msra.mxu1 %v2199_v15  ;;  %571 = vmatprep.mubr.f32.mxu1 %v3440_v17  ;;  %v2405_v15 = vpack.c.bf16 %v1506_v6, %v1502_v5  ;;  %v1525_v6 = vld [vmem:[%s3291_s8 + $0x1c0] sm:$0xff] }
 0x125   : > { %2202 = vmatprep.subr.bf16.mxu1 %v2201_v16  ;;  %v2215_v16 = vpack.c.bf16 %v455_v9, %v453_v8  ;;  %v1529_v8 = vld [vmem:[%s3291_s8 + $0x1e0] sm:$0xff]  ;;  %v1534_v9 = vld [vmem:[%s3291_s8 + $0x208] sm:$0xff] }
 0x126   : > { %944 = vmatmul.mubr.f32.vlgmr.msra.gmra.mrb[0].mxu0 %v3438_v14  ;;  %v2421_v21 = vpack.c.bf16 %v1538_v11, %v1534_v9  ;;  %v1557_v11 = vld [vmem:[%s3291_s8 + $0x2c0] sm:$0xff] }
 0x127   : > { %572 = vmatmul.mubr.f32.gmra.mrb[2].mxu1 %v3448_v22  ;;  %949 = vmatprep.mubr.f32.mxu0 %v3440_v17 }
 0x128   : > { %577 = vmatprep.mubr.f32.mxu1 %v3452_v25  ;;  %2392 = vmatpush1.bf16.xpose.msra.mxu0 %v2391_v26  ;;  %v1510_v26 = vld [vmem:[%s3291_s8 + $0x148] sm:$0xff] }
 0x129   : > { %2394 = vmatprep.subr.bf16.mxu0 %v2393_v29  ;;  %v459_v29 = vld [vmem:[%s3283_s14 + $0x2b0] sm:$0xff]  ;;  %v2409_v35 = vpack.c.bf16 %v1514_v27, %v1510_v26  ;;  %v1533_v27 = vld [vmem:[%s3291_s8 + $0x200] sm:$0xff] }
 0x12a   : > { %950 = vmatmul.mubr.f32.gmra.mrb[2].mxu0 %v3448_v22  ;;  %v2219_v37 = vpack.c.bf16 %v459_v29, %v457_v28  ;;  %v1537_v28 = vld [vmem:[%s3291_s8 + $0x220] sm:$0xff]  ;;  %v1542_v29 = vld [vmem:[%s3291_s8 + $0x248] sm:$0xff] }
 0x12b   : > { %578 = vmatmul.mubr.f32.gmra.mrb[4].mxu1 %v3459_v31  ;;  %955 = vmatprep.mubr.f32.mxu0 %v3452_v25 }
 0x12c   : > { %2204 = vmatpush1.bf16.xpose.msra.mxu1 %v2203_v30  ;;  %583 = vmatprep.mubr.f32.mxu1 %v3461_v33  ;;  %v462_v30 = vld [vmem:[%s3283_s14 + $0x2c8] sm:$0xff] }
 0x12d   : > { %2206 = vmatprep.subr.bf16.mxu1 %v2205_v32  ;;  %v464_v32 = vld [vmem:[%s3283_s14 + $0x2d8] sm:$0xff] }
 0x12e   : > { %956 = vmatmul.mubr.f32.gmra.mrb[4].mxu0 %v3459_v31  ;;  %v2221_v38 = vpack.c.bf16 %v464_v32, %v462_v30  ;;  %v1546_v30 = vld [vmem:[%s3291_s8 + $0x268] sm:$0xff]  ;;  %v473_v32 = vld [vmem:[%s3283_s14 + $0x320] sm:$0xff] }
 0x12f   : > { %584 = vmatmul.mubr.f32.gmra.mrb[6].mxu1 %v3468_v36  ;;  %961 = vmatprep.mubr.f32.mxu0 %v3461_v33 }
 0x130   : > { %589 = vmatprep.mubr.f32.mxu1 %v3474_v41  ;;  %2396 = vmatpush1.bf16.xpose.msra.mxu0 %v2395_v44  ;;  %v461_v44 = vld [vmem:[%s3283_s14 + $0x2c0] sm:$0xff] }
 0x131   : > { %2398 = vmatprep.subr.bf16.mxu0 %v2397_v45  ;;  %v466_v45 = vld [vmem:[%s3283_s14 + $0x2e8] sm:$0xff] }
 0x132   : > { %962 = vmatmul.mubr.f32.gmra.mrb[6].mxu0 %v3468_v36 }
 0x133   : > { %590 = vmatmul.mubr.f32.gmra.mrb[8].mxu1 %v3482_v47  ;;  %967 = vmatprep.mubr.f32.mxu0 %v3474_v41 }
 0x134   : > { %2208 = vmatpush1.bf16.xpose.msra.mxu1 %v2207_v46  ;;  %595 = vmatprep.mubr.f32.mxu1 %v3484_v49  ;;  %v468_v46 = vld [vmem:[%s3283_s14 + $0x2f8] sm:$0xff] }
 0x135   : > { %2210 = vmatprep.subr.bf16.mxu1 %v2209_v48  ;;  %v2411_v48 = vpack.c.bf16 %v1513_v40, %v1509_v39  ;;  %v2225_v53 = vpack.c.bf16 %v468_v46, %v466_v45  ;;  %v2425_v39 = vpack.c.bf16 %v1546_v30, %v1542_v29  ;;  %v1554_v45 = vld [vmem:[%s3291_s8 + $0x2a8] sm:$0xff]  ;;  %v477_v46 = vld [vmem:[%s3283_s14 + $0x340] sm:$0xff] }
 0x136   : > { %968 = vmatmul.mubr.f32.gmra.mrb[8].mxu0 %v3482_v47  ;;  %v1565_v30 = vld [vmem:[%s3291_s8 + $0x300] sm:$0xff] }
 0x137   : > { %596 = vmatmul.mubr.f32.gmra.mrb[10].mxu1 %v3492_v52  ;;  %973 = vmatprep.mubr.f32.mxu0 %v3484_v49 }
 0x138   : > { %601 = vmatprep.mubr.f32.mxu1 %v3498_v57  ;;  %2400 = vmatpush1.bf16.xpose.msra.mxu0 %v2399_v60  ;;  %v467_v60 = vld [vmem:[%s3283_s14 + $0x2f0] sm:$0xff] }
 0x139   : > { %2402 = vmatprep.subr.bf16.mxu0 %v2401_v61  ;;  %v470_v61 = vld [vmem:[%s3283_s14 + $0x308] sm:$0xff]  ;;  %v2227_v3 = vpack.c.bf16 %v467_v60, %v465_v59  ;;  %v1553_v59 = vld [vmem:[%s3291_s8 + $0x2a0] sm:$0xff] }
 0x13a   : > { %974 = vmatmul.mubr.f32.gmra.mrb[10].mxu0 %v3492_v52  ;;  %v1558_v60 = vld [vmem:[%s3291_s8 + $0x2c8] sm:$0xff] }
 0x13b   : > { %602 = vmatmul.mubr.f32.gmra.mrb[12].mxu1 %v3506_v63  ;;  %979 = vmatprep.mubr.f32.mxu0 %v3498_v57 }
 0x13c   : > { %2212 = vmatpush1.bf16.xpose.msra.mxu1 %v2211_v62  ;;  %607 = vmatprep.mubr.f32.mxu1 %v3508_v1  ;;  %v472_v62 = vld [vmem:[%s3283_s14 + $0x318] sm:$0xff] }
 0x13d   : > { %2214 = vmatprep.subr.bf16.mxu1 %v2213_v0  ;;  %v2415_v0 = vpack.c.bf16 %v1521_v55, %v1517_v54  ;;  %v2229_v5 = vpack.c.bf16 %v472_v62, %v470_v61  ;;  %v1562_v61 = vld [vmem:[%s3291_s8 + $0x2e8] sm:$0xff]  ;;  %v481_v62 = vld [vmem:[%s3283_s14 + $0x360] sm:$0xff] }
 0x13e   : > { %980 = vmatmul.mubr.f32.gmra.mrb[12].mxu0 %v3506_v63 }
 0x13f   : > { %608 = vmatmul.mubr.f32.gmra.mrb[14].mxu1 %v3516_v4  ;;  %985 = vmatprep.mubr.f32.mxu0 %v3508_v1 }
 0x140   : > { %613 = vmatprep.mubr.f32.mxu1 %v3522_v10  ;;  %2404 = vmatpush1.bf16.xpose.msra.mxu0 %v2403_v13  ;;  %v471_v13 = vld [vmem:[%s3283_s14 + $0x310] sm:$0xff] }
 0x141   : > { %2406 = vmatprep.subr.bf16.mxu0 %v2405_v15  ;;  %v474_v15 = vld [vmem:[%s3283_s14 + $0x328] sm:$0xff]  ;;  %v2231_v23 = vpack.c.bf16 %v471_v13, %v469_v12  ;;  %v1561_v12 = vld [vmem:[%s3291_s8 + $0x2e0] sm:$0xff] }
 0x142   : > { %986 = vmatmul.mubr.f32.gmra.mrb[14].mxu0 %v3516_v4  ;;  %v1566_v13 = vld [vmem:[%s3291_s8 + $0x308] sm:$0xff] }
 0x143   : > { %614 = vmatmul.mubr.f32.gmra.mrb[16].mxu1 %v3530_v18  ;;  %991 = vmatprep.mubr.f32.mxu0 %v3522_v10 }
 0x144   : > { %2216 = vmatpush1.bf16.xpose.msra.mxu1 %v2215_v16  ;;  %619 = vmatprep.mubr.f32.mxu1 %v3532_v20  ;;  %v476_v16 = vld [vmem:[%s3283_s14 + $0x338] sm:$0xff] }
 0x145   : > { %2218 = vmatprep.subr.bf16.mxu1 %v2217_v19  ;;  %v2419_v19 = vpack.c.bf16 %v1529_v8, %v1525_v6  ;;  %v2233_v26 = vpack.c.bf16 %v476_v16, %v474_v15  ;;  %v2433_v6 = vpack.c.bf16 %v1562_v61, %v1558_v60  ;;  %v1570_v15 = vld [vmem:[%s3291_s8 + $0x328] sm:$0xff]  ;;  %v485_v16 = vld [vmem:[%s3283_s14 + $0x380] sm:$0xff] }
 0x146   : > { %992 = vmatmul.mubr.f32.gmra.mrb[16].mxu0 %v3530_v18  ;;  %v1581_v61 = vld [vmem:[%s3291_s8 + $0x380] sm:$0xff] }
 0x147   : > { %620 = vmatmul.mubr.f32.gmra.mrb[18].mxu1 %v3540_v24  ;;  %997 = vmatprep.mubr.f32.mxu0 %v3532_v20 }
 0x148   : > { %690 = vmatprep.mubr.f32.mxu1 %v3346_v7  ;;  %2408 = vmatpush1.bf16.xpose.msra.mxu0 %v2407_v34  ;;  %v463_v7 = vld [vmem:[%s3283_s14 + $0x2d0] sm:$0xff] }
 0x149   : > { %2410 = vmatprep.subr.bf16.mxu0 %v2409_v35  ;;  %v2223_v51 = vpack.c.bf16 %v463_v7, %v461_v44  ;;  %v475_v34 = vld [vmem:[%s3283_s14 + $0x330] sm:$0xff]  ;;  %v478_v35 = vld [vmem:[%s3283_s14 + $0x348] sm:$0xff]  ;;  %v1545_v44 = vld [vmem:[%s3291_s8 + $0x260] sm:$0xff] }
 0x14a   : > { %998 = vmatmul.mubr.f32.gmra.mrb[18].mxu0 %v3540_v24  ;;  %v2235_v40 = vpack.c.bf16 %v475_v34, %v473_v32  ;;  %v1550_v7 = vld [vmem:[%s3291_s8 + $0x288] sm:$0xff]  ;;  %v1569_v32 = vld [vmem:[%s3291_s8 + $0x320] sm:$0xff] }
 0x14b   : > { %v2429_v54 = vpack.c.bf16 %v1554_v45, %v1550_v7  ;;  %v1574_v34 = vld [vmem:[%s3291_s8 + $0x348] sm:$0xff]  ;;  %v1573_v45 = vld [vmem:[%s3291_s8 + $0x340] sm:$0xff] }
 0x14c   : > { %2220 = vmatpush1.bf16.xpose.msra.mxu1 %v2219_v37  ;;  %v480_v37 = vld [vmem:[%s3283_s14 + $0x358] sm:$0xff] }
 0x14d   : > { %2222 = vmatprep.subr.bf16.mxu1 %v2221_v38  ;;  %v2423_v38 = vpack.c.bf16 %v1537_v28, %v1533_v27  ;;  %v2237_v42 = vpack.c.bf16 %v480_v37, %v478_v35  ;;  %v2437_v27 = vpack.c.bf16 %v1570_v15, %v1566_v13  ;;  %v1578_v35 = vld [vmem:[%s3291_s8 + $0x368] sm:$0xff]  ;;  %v489_v37 = vld [vmem:[%s3283_s14 + $0x3a0] sm:$0xff] }
 0x14e   : > { %v1589_v15 = vld [vmem:[%s3291_s8 + $0x3c0] sm:$0xff] }
 0x150   : > { %2412 = vmatpush1.bf16.xpose.msra.mxu0 %v2411_v48  ;;  %v479_v48 = vld [vmem:[%s3283_s14 + $0x350] sm:$0xff] }
 0x151   : > { %2414 = vmatprep.subr.bf16.mxu0 %v2413_v50  ;;  %v482_v50 = vld [vmem:[%s3283_s14 + $0x368] sm:$0xff]  ;;  %v2239_v55 = vpack.c.bf16 %v479_v48, %v477_v46  ;;  %v1577_v46 = vld [vmem:[%s3291_s8 + $0x360] sm:$0xff] }
 0x152   : > { %v1582_v48 = vld [vmem:[%s3291_s8 + $0x388] sm:$0xff] }
 0x154   : > { %2224 = vmatpush1.bf16.xpose.msra.mxu1 %v2223_v51  ;;  %v484_v51 = vld [vmem:[%s3283_s14 + $0x378] sm:$0xff] }
 0x155   : > { %2226 = vmatprep.subr.bf16.mxu1 %v2225_v53  ;;  %v2427_v53 = vpack.c.bf16 %v1545_v44, %v1541_v43  ;;  %v2241_v56 = vpack.c.bf16 %v484_v51, %v482_v50  ;;  %v2441_v43 = vpack.c.bf16 %v1578_v35, %v1574_v34  ;;  %v1586_v50 = vld [vmem:[%s3291_s8 + $0x3a8] sm:$0xff]  ;;  %v493_v51 = vld [vmem:[%s3283_s14 + $0x3c0] sm:$0xff]  ;;  %v826_v35 = vld [vmem:[%s3289_s9 + $0x258] sm:$0xff] }
 0x156   : > { %v824_v34 = vld [vmem:[%s3289_s9 + $0x248] sm:$0xff] }
 0x158   : > { %2416 = vmatpush1.bf16.xpose.msra.mxu0 %v2415_v0  ;;  %v483_v0 = vld [vmem:[%s3283_s14 + $0x370] sm:$0xff] }
 0x159   : > { %2418 = vmatprep.subr.bf16.mxu0 %v2417_v2  ;;  %v486_v2 = vld [vmem:[%s3283_s14 + $0x388] sm:$0xff]  ;;  %v2243_v8 = vpack.c.bf16 %v483_v0, %v481_v62  ;;  %v1585_v62 = vld [vmem:[%s3291_s8 + $0x3a0] sm:$0xff] }
 0x15a   : > { %v1590_v0 = vld [vmem:[%s3291_s8 + $0x3c8] sm:$0xff] }
 0x15c   : > { %2228 = vmatpush1.bf16.xpose.msra.mxu1 %v2227_v3  ;;  %v488_v3 = vld [vmem:[%s3283_s14 + $0x398] sm:$0xff] }
 0x15d   : > { %2230 = vmatprep.subr.bf16.mxu1 %v2229_v5  ;;  %v2431_v5 = vpack.c.bf16 %v1553_v59, %v1549_v58  ;;  %v2245_v9 = vpack.c.bf16 %v488_v3, %v486_v2  ;;  %v2445_v58 = vpack.c.bf16 %v1586_v50, %v1582_v48  ;;  %v1594_v2 = vld [vmem:[%s3291_s8 + $0x3e8] sm:$0xff]  ;;  %v497_v3 = vld [vmem:[%s3283_s14 + $0x3e0] sm:$0xff] }
 0x15e   : > { %v839_v48 = vld [vmem:[%s3289_s9 + $0x2c0] sm:$0xff]  ;;  %v844_v50 = vld [vmem:[%s3289_s9 + $0x2e8] sm:$0xff] }
 0x160   : > { %2420 = vmatpush1.bf16.xpose.msra.mxu0 %v2419_v19  ;;  %v487_v19 = vld [vmem:[%s3283_s14 + $0x390] sm:$0xff] }
 0x161   : > { %2422 = vmatprep.subr.bf16.mxu0 %v2421_v21  ;;  %v490_v21 = vld [vmem:[%s3283_s14 + $0x3a8] sm:$0xff]  ;;  %v2247_v28 = vpack.c.bf16 %v487_v19, %v485_v16  ;;  %v1593_v16 = vld [vmem:[%s3291_s8 + $0x3e0] sm:$0xff] }
 0x162   : > { %v815_v19 = vld [vmem:[%s3289_s9 + $0x200] sm:$0xff] }
 0x164   : > { %2232 = vmatpush1.bf16.xpose.msra.mxu1 %v2231_v23  ;;  %v492_v23 = vld [vmem:[%s3283_s14 + $0x3b8] sm:$0xff] }
 0x165   : > { %2234 = vmatprep.subr.bf16.mxu1 %v2233_v26  ;;  %v2435_v26 = vpack.c.bf16 %v1561_v12, %v1557_v11  ;;  %v2249_v29 = vpack.c.bf16 %v492_v23, %v490_v21  ;;  %v2449_v11 = vpack.c.bf16 %v1594_v2, %v1590_v0  ;;  %v817_v21 = vld [vmem:[%s3289_s9 + $0x210] sm:$0xff]  ;;  %v820_v23 = vld [vmem:[%s3289_s9 + $0x228] sm:$0xff]  ;;  %v854_v2 = vld [vmem:[%s3289_s9 + $0x338] sm:$0xff] }
 0x166   : > { %v852_v0 = vld [vmem:[%s3289_s9 + $0x328] sm:$0xff] }
 0x168   : > { %2424 = vmatpush1.bf16.xpose.msra.mxu0 %v2423_v38  ;;  %v491_v38 = vld [vmem:[%s3283_s14 + $0x3b0] sm:$0xff] }
 0x169   : > { %2426 = vmatprep.subr.bf16.mxu0 %v2425_v39  ;;  %v494_v39 = vld [vmem:[%s3283_s14 + $0x3c8] sm:$0xff]  ;;  %v2251_v44 = vpack.c.bf16 %v491_v38, %v489_v37  ;;  %v2333_v38 = vpack.c.bf16 %v826_v35, %v824_v34 }
 0x16c   : > { %2236 = vmatpush1.bf16.xpose.msra.mxu1 %v2235_v40  ;;  %v496_v40 = vld [vmem:[%s3283_s14 + $0x3d8] sm:$0xff] }
 0x16d   : > { %2238 = vmatprep.subr.bf16.mxu1 %v2237_v42  ;;  %v2439_v42 = vpack.c.bf16 %v1569_v32, %v1565_v30  ;;  %v2253_v7 = vpack.c.bf16 %v496_v40, %v494_v39  ;;  %v819_v30 = vld [vmem:[%s3289_s9 + $0x220] sm:$0xff]  ;;  %v821_v32 = vld [vmem:[%s3289_s9 + $0x230] sm:$0xff]  ;;  %v828_v39 = vld [vmem:[%s3289_s9 + $0x268] sm:$0xff] }
 0x16e   : > { %v2331_v37 = vpack.c.bf16 %v821_v32, %v819_v30  ;;  %v830_v40 = vld [vmem:[%s3289_s9 + $0x278] sm:$0xff]  ;;  %v864_v30 = vld [vmem:[%s3289_s9 + $0x388] sm:$0xff] }
 0x16f   : > { %v866_v32 = vld [vmem:[%s3289_s9 + $0x398] sm:$0xff] }
 0x170   : > { %2428 = vmatpush1.bf16.xpose.msra.mxu0 %v2427_v53  ;;  %v495_v53 = vld [vmem:[%s3283_s14 + $0x3d0] sm:$0xff] }
 0x171   : > { %2430 = vmatprep.subr.bf16.mxu0 %v2429_v54  ;;  %v498_v54 = vld [vmem:[%s3283_s14 + $0x3e8] sm:$0xff]  ;;  %v2255_v59 = vpack.c.bf16 %v495_v53, %v493_v51  ;;  %v846_v51 = vld [vmem:[%s3289_s9 + $0x2f8] sm:$0xff] }
 0x174   : > { %2240 = vmatpush1.bf16.xpose.msra.mxu1 %v2239_v55  ;;  %v500_v55 = vld [vmem:[%s3283_s14 + $0x3f8] sm:$0xff] }
 0x175   : > { %2242 = vmatprep.subr.bf16.mxu1 %v2241_v56  ;;  %v2443_v56 = vpack.c.bf16 %v1577_v46, %v1573_v45  ;;  %v2257_v60 = vpack.c.bf16 %v500_v55, %v498_v54  ;;  %v840_v45 = vld [vmem:[%s3289_s9 + $0x2c8] sm:$0xff]  ;;  %v842_v46 = vld [vmem:[%s3289_s9 + $0x2d8] sm:$0xff]  ;;  %v2353_v54 = vpack.c.bf16 %v846_v51, %v844_v50  ;;  %v845_v55 = vld [vmem:[%s3289_s9 + $0x2f0] sm:$0xff] }
 0x178   : > { %2432 = vmatpush1.bf16.xpose.msra.mxu0 %v2431_v5  ;;  %v499_v5 = vld [vmem:[%s3283_s14 + $0x3f0] sm:$0xff] }
 0x179   : > { %2434 = vmatprep.subr.bf16.mxu0 %v2433_v6  ;;  %v816_v6 = vld [vmem:[%s3289_s9 + $0x208] sm:$0xff]  ;;  %v2259_v12 = vpack.c.bf16 %v499_v5, %v497_v3  ;;  %v2361_v5 = vpack.c.bf16 %v854_v2, %v852_v0 }
 0x17c   : > { %2244 = vmatpush1.bf16.xpose.msra.mxu1 %v2243_v8  ;;  %v818_v8 = vld [vmem:[%s3289_s9 + $0x218] sm:$0xff] }
 0x17d   : > { %2246 = vmatprep.subr.bf16.mxu1 %v2245_v9  ;;  %v2447_v9 = vpack.c.bf16 %v1585_v62, %v1581_v61  ;;  %v2325_v13 = vpack.c.bf16 %v818_v8, %v816_v6  ;;  %v847_v61 = vld [vmem:[%s3289_s9 + $0x300] sm:$0xff]  ;;  %v849_v62 = vld [vmem:[%s3289_s9 + $0x310] sm:$0xff] }
 0x17e   : > { %v2359_v3 = vpack.c.bf16 %v849_v62, %v847_v61  ;;  %v851_v6 = vld [vmem:[%s3289_s9 + $0x320] sm:$0xff]  ;;  %v853_v8 = vld [vmem:[%s3289_s9 + $0x330] sm:$0xff] }
 0x180   : > { %2436 = vmatpush1.bf16.xpose.msra.mxu0 %v2435_v26  ;;  %v822_v26 = vld [vmem:[%s3289_s9 + $0x238] sm:$0xff] }
 0x181   : > { %2438 = vmatprep.subr.bf16.mxu0 %v2437_v27  ;;  %v2451_v27 = vpack.c.bf16 %v1593_v16, %v1589_v15  ;;  %v855_v15 = vld [vmem:[%s3289_s9 + $0x340] sm:$0xff]  ;;  %v857_v16 = vld [vmem:[%s3289_s9 + $0x350] sm:$0xff] }
 0x184   : > { %2248 = vmatpush1.bf16.xpose.msra.mxu1 %v2247_v28  ;;  %v2327_v28 = vpack.c.bf16 %v817_v21, %v815_v19  ;;  %v860_v19 = vld [vmem:[%s3289_s9 + $0x368] sm:$0xff]  ;;  %v862_v21 = vld [vmem:[%s3289_s9 + $0x378] sm:$0xff] }
 0x185   : > { %2250 = vmatprep.subr.bf16.mxu1 %v2249_v29  ;;  %v2329_v29 = vpack.c.bf16 %v822_v26, %v820_v23  ;;  %v2367_v23 = vpack.c.bf16 %v857_v16, %v855_v15  ;;  %v2369_v26 = vpack.c.bf16 %v862_v21, %v860_v19 }
 0x188   : > { %2440 = vmatpush1.bf16.xpose.msra.mxu0 %v2439_v42  ;;  %v832_v42 = vld [vmem:[%s3289_s9 + $0x288] sm:$0xff] }
 0x189   : > { %2442 = vmatprep.subr.bf16.mxu0 %v2441_v43  ;;  %v834_v43 = vld [vmem:[%s3289_s9 + $0x298] sm:$0xff] }
 0x18c   : > { %2252 = vmatpush1.bf16.xpose.msra.mxu1 %v2251_v44  ;;  %v836_v44 = vld [vmem:[%s3289_s9 + $0x2a8] sm:$0xff] }
 0x18d   : > { %2254 = vmatprep.subr.bf16.mxu1 %v2253_v7  ;;  %v838_v7 = vld [vmem:[%s3289_s9 + $0x2b8] sm:$0xff] }
 0x190   : > { %2444 = vmatpush1.bf16.xpose.msra.mxu0 %v2443_v56  ;;  %v848_v56 = vld [vmem:[%s3289_s9 + $0x308] sm:$0xff] }
 0x191   : > { %2446 = vmatprep.subr.bf16.mxu0 %v2445_v58  ;;  %v850_v58 = vld [vmem:[%s3289_s9 + $0x318] sm:$0xff] }
 0x194   : > { %2256 = vmatpush1.bf16.xpose.msra.mxu1 %v2255_v59 }
 0x195   : > { %2258 = vmatprep.subr.bf16.mxu1 %v2257_v60  ;;  %v2357_v60 = vpack.c.bf16 %v850_v58, %v848_v56  ;;  %v872_v58 = vld [vmem:[%s3289_s9 + $0x3c8] sm:$0xff] }
 0x198   : > { %2448 = vmatpush1.bf16.xpose.msra.mxu0 %v2447_v9  ;;  %v856_v9 = vld [vmem:[%s3289_s9 + $0x348] sm:$0xff] }
 0x199   : > { %2450 = vmatprep.subr.bf16.mxu0 %v2449_v11  ;;  %v858_v11 = vld [vmem:[%s3289_s9 + $0x358] sm:$0xff] }
 0x19c   : > { %2260 = vmatpush1.bf16.xpose.msra.mxu1 %v2259_v12  ;;  %v2363_v12 = vpack.c.bf16 %v853_v8, %v851_v6 }
 0x19d   : > { %2326 = vmatprep.subr.bf16.mxu1 %v2325_v13  ;;  %v2365_v13 = vpack.c.bf16 %v858_v11, %v856_v9 }
 0x1a0   : > { %2452 = vmatpush1.bf16.xpose.msra.mxu0 %v2451_v27  ;;  %v859_v27 = vld [vmem:[%s3289_s9 + $0x360] sm:$0xff] }
 0x1a3   : > { %691 = vmatmul.mubr.f32.vlgmr.msra.gmra.mrb[20].mxu1 %v3438_v14  ;;  %v823_v14 = vld [vmem:[%s3289_s9 + $0x240] sm:$0xff] }
 0x1a4   : > { %2328 = vmatpush1.bf16.xpose.msra.mxu1 %v2327_v28  ;;  %696 = vmatprep.mubr.f32.mxu1 %v3440_v17  ;;  %v825_v17 = vld [vmem:[%s3289_s9 + $0x250] sm:$0xff] }
 0x1a5   : > { %2330 = vmatprep.subr.bf16.mxu1 %v2329_v29  ;;  %v861_v28 = vld [vmem:[%s3289_s9 + $0x370] sm:$0xff] }
 0x1a7   : > { %697 = vmatmul.mubr.f32.gmra.mrb[22].mxu1 %v3448_v22  ;;  %v2335_v22 = vpack.c.bf16 %v825_v17, %v823_v14  ;;  %v1472_v14 = vld [vmem:[%s3291_s8 + $0x18] sm:$0xff] }
 0x1a8   : > { %702 = vmatprep.mubr.f32.mxu1 %v3452_v25  ;;  %v2337_v25 = vpack.c.bf16 %v830_v40, %v828_v39  ;;  %v1476_v17 = vld [vmem:[%s3291_s8 + $0x38] sm:$0xff]  ;;  %v2373_v39 = vpack.c.bf16 %v866_v32, %v864_v30  ;;  %v873_v30 = vld [vmem:[%s3289_s9 + $0x3d0] sm:$0xff] }
 0x1a9   : > { %v2453_v40 = vpack.c.bf16 %v1476_v17, %v1472_v14 }
 0x1ab   : > { %703 = vmatmul.mubr.f32.gmra.mrb[24].mxu1 %v3459_v31  ;;  %v827_v31 = vld [vmem:[%s3289_s9 + $0x260] sm:$0xff]  ;;  %2454 = vmatprep.subr.bf16.mxu0 %v2453_v40 }
 0x1ac   : > { %2332 = vmatpush1.bf16.xpose.msra.mxu1 %v2331_v37  ;;  %708 = vmatprep.mubr.f32.mxu1 %v3461_v33  ;;  %v829_v33 = vld [vmem:[%s3289_s9 + $0x270] sm:$0xff] }
 0x1ad   : > { %2334 = vmatprep.subr.bf16.mxu1 %v2333_v38  ;;  %v2371_v38 = vpack.c.bf16 %v861_v28, %v859_v27  ;;  %v871_v28 = vld [vmem:[%s3289_s9 + $0x3c0] sm:$0xff] }
 0x1af   : > { %709 = vmatmul.mubr.f32.gmra.mrb[26].mxu1 %v3468_v36  ;;  %v2339_v36 = vpack.c.bf16 %v829_v33, %v827_v31 }
 0x1b0   : > { %714 = vmatprep.mubr.f32.mxu1 %v3474_v41  ;;  %v2341_v41 = vpack.c.bf16 %v834_v43, %v832_v42 }
 0x1b3   : > { %715 = vmatmul.mubr.f32.gmra.mrb[28].mxu1 %v3482_v47  ;;  %v831_v47 = vld [vmem:[%s3289_s9 + $0x280] sm:$0xff] }
 0x1b4   : > { %2336 = vmatpush1.bf16.xpose.msra.mxu1 %v2335_v22  ;;  %720 = vmatprep.mubr.f32.mxu1 %v3484_v49  ;;  %v833_v49 = vld [vmem:[%s3289_s9 + $0x290] sm:$0xff] }
 0x1b5   : > { %2338 = vmatprep.subr.bf16.mxu1 %v2337_v25 }
 0x1b7   : > { %721 = vmatmul.mubr.f32.gmra.mrb[30].mxu1 %v3492_v52  ;;  %v2343_v52 = vpack.c.bf16 %v833_v49, %v831_v47  ;;  %v868_v47 = vld [vmem:[%s3289_s9 + $0x3a8] sm:$0xff]  ;;  %v870_v49 = vld [vmem:[%s3289_s9 + $0x3b8] sm:$0xff] }
 0x1b8   : > { %726 = vmatprep.mubr.f32.mxu1 %v3498_v57  ;;  %v2345_v57 = vpack.c.bf16 %v838_v7, %v836_v44 }
 0x1bb   : > { %727 = vmatmul.mubr.f32.gmra.mrb[32].mxu1 %v3506_v63  ;;  %v835_v63 = vld [vmem:[%s3289_s9 + $0x2a0] sm:$0xff] }
 0x1bc   : > { %2340 = vmatpush1.bf16.xpose.msra.mxu1 %v2339_v36  ;;  %732 = vmatprep.mubr.f32.mxu1 %v3508_v1  ;;  %v837_v1 = vld [vmem:[%s3289_s9 + $0x2b0] sm:$0xff]  ;;  %v863_v36 = vld [vmem:[%s3289_s9 + $0x380] sm:$0xff] }
 0x1bd   : > { %2342 = vmatprep.subr.bf16.mxu1 %v2341_v41  ;;  %v865_v41 = vld [vmem:[%s3289_s9 + $0x390] sm:$0xff] }
 0x1bf   : > { %733 = vmatmul.mubr.f32.gmra.mrb[34].mxu1 %v3516_v4  ;;  %v2347_v4 = vpack.c.bf16 %v837_v1, %v835_v63 }
 0x1c0   : > { %738 = vmatprep.mubr.f32.mxu1 %v3522_v10  ;;  %v2788_v10 = vld [vmem:[#allocation3 + $0x8] sm:$0xff] }
 0x1c3   : > { %739 = vmatmul.mubr.f32.gmra.mrb[36].mxu1 %v3530_v18  ;;  %v2349_v18 = vpack.c.bf16 %v842_v46, %v840_v45  ;;  %v2377_v45 = vpack.c.bf16 %v870_v49, %v868_v47 }
 0x1c4   : > { %2344 = vmatpush1.bf16.xpose.msra.mxu1 %v2343_v52  ;;  %744 = vmatprep.mubr.f32.mxu1 %v3532_v20  ;;  %v841_v20 = vld [vmem:[%s3289_s9 + $0x2d0] sm:$0xff] }
 0x1c5   : > { %2346 = vmatprep.subr.bf16.mxu1 %v2345_v57  ;;  %v2351_v53 = vpack.c.bf16 %v841_v20, %v839_v48  ;;  %v2375_v57 = vpack.c.bf16 %v865_v41, %v863_v36 }
 0x1c7   : > { %745 = vmatmul.mubr.f32.gmra.mrb[38].mxu1 %v3540_v24  ;;  %v843_v24 = vld [vmem:[%s3289_s9 + $0x2e0] sm:$0xff] }
 0x1c8   : > { %1068 = vmatprep.mubr.f32.mxu1 %v2788_v10  ;;  %v2355_v59 = vpack.c.bf16 %v845_v55, %v843_v24  ;;  %v867_v24 = vld [vmem:[%s3289_s9 + $0x3a0] sm:$0xff]  ;;  %v869_v55 = vld [vmem:[%s3289_s9 + $0x3b0] sm:$0xff] }
 0x1cc   : > { %2348 = vmatpush1.bf16.xpose.msra.mxu1 %v2347_v4 }
 0x1cd   : > { %2350 = vmatprep.subr.bf16.mxu1 %v2349_v18 }
 0x1d4   : > { %2352 = vmatpush1.bf16.xpose.msra.mxu1 %v2351_v53 }
 0x1d5   : > { %2354 = vmatprep.subr.bf16.mxu1 %v2353_v54 }
 0x1dc   : > { %2356 = vmatpush1.bf16.xpose.msra.mxu1 %v2355_v59  ;;  %v874_v59 = vld [vmem:[%s3289_s9 + $0x3d8] sm:$0xff] }
 0x1dd   : > { %2358 = vmatprep.subr.bf16.mxu1 %v2357_v60  ;;  %v2381_v9 = vpack.c.bf16 %v874_v59, %v872_v58  ;;  %v875_v58 = vld [vmem:[%s3289_s9 + $0x3e0] sm:$0xff]  ;;  %v877_v59 = vld [vmem:[%s3289_s9 + $0x3f0] sm:$0xff] }
 0x1e4   : > { %2360 = vmatpush1.bf16.xpose.msra.mxu1 %v2359_v3  ;;  %v2379_v3 = vpack.c.bf16 %v869_v55, %v867_v24 }
 0x1e5   : > { %2362 = vmatprep.subr.bf16.mxu1 %v2361_v5 }
 0x1ec   : > { %2364 = vmatpush1.bf16.xpose.msra.mxu1 %v2363_v12 }
 0x1ed   : > { %2366 = vmatprep.subr.bf16.mxu1 %v2365_v13 }
 0x1f4   : > { %2368 = vmatpush1.bf16.xpose.msra.mxu1 %v2367_v23 }
 0x1f5   : > { %2370 = vmatprep.subr.bf16.mxu1 %v2369_v26 }
 0x1f6   : > { %v3702_v29 = vpop.f32.mrb[0].mxu1 }
 0x1f7   : > { %v2083_v34 = vmul.f32 -1.442695, %v3702_v29  ;;  %v3707_v35 = vpop.f32.mrb[1].mxu1 }
 0x1f8   : > { %v2084_v37 = vmul.f32 -1.442695, %v3707_v35 }
 0x1f9   : > { %2628 = vpow2.f32 %v2083_v34  ;;  %v3714_v25 = vpop.f32.mrb[0].mxu0 }
 0x1fa   : > { %2630 = vpow2.f32 %v2084_v37  ;;  %v3712_v22 = vpop.f32.mrb[2].mxu1  ;;  %v3719_v42 = vpop.f32.mrb[1].mxu0  ;;  %v876_v37 = vld [vmem:[%s3289_s9 + $0x3e8] sm:$0xff] }
 0x1fb   : > { %v2087_v31 = vmul.f32 -1.442695, %v3712_v22  ;;  %v3717_v33 = vpop.f32.mrb[3].mxu1 }
 0x1fc   : > { %2372 = vmatpush1.bf16.xpose.msra.mxu1 %v2371_v38  ;;  %v2088_v43 = vmul.f32 -1.442695, %v3717_v33  ;;  %v878_v38 = vld [vmem:[%s3289_s9 + $0x3f8] sm:$0xff] }
 0x1fd   : > { %2374 = vmatprep.subr.bf16.mxu1 %v2373_v39  ;;  %2632 = vpow2.f32 %v2087_v31  ;;  %v3732_v1 = vpop.f32.mrb[2].mxu0 }
 0x1fe   : > { %2634 = vpow2.f32 %v2088_v43  ;;  %v3726_v44 = vpop.f32.mrb[4].mxu1  ;;  %v3734_v46 = vpop.f32.mrb[3].mxu0  ;;  %v2383_v43 = vpack.c.bf16 %v873_v30, %v871_v28 }
 0x1ff   : > { %v2091_v7 = vmul.f32 -1.442695, %v3726_v44  ;;  %v3729_v52 = vpop.f32.mrb[5].mxu1 }
 0x200   : > { %v2092_v63 = vmul.f32 -1.442695, %v3729_v52 }
 0x201   : > { %2636 = vpow2.f32 %v2091_v7  ;;  %v3742_v53 = vpop.f32.mrb[4].mxu0 }
 0x202   : > { %2638 = vpow2.f32 %v2092_v63  ;;  %v3736_v4 = vpop.f32.mrb[6].mxu1  ;;  %v3746_v56 = vpop.f32.mrb[5].mxu0 }
 0x203   : > { %v2629_v10 = vpop.eup %2628  ;;  %v2095_v18 = vmul.f32 -1.442695, %v3736_v4  ;;  %v3739_v48 = vpop.f32.mrb[7].mxu1 }
 0x204   : > { %v2631_v20 = vpop.eup %2630  ;;  %v1249_v50 = vadd.f32 1.0, %v2629_v10  ;;  %2376 = vmatpush1.bf16.xpose.msra.mxu1 %v2375_v57  ;;  %v2096_v51 = vmul.f32 -1.442695, %v3739_v48  ;;  %v2385_v57 = vpack.c.bf16 %v878_v38, %v876_v37  ;;  %v1475_v10 = vld [vmem:[%s3291_s8 + $0x30] sm:$0xff] }
 0x205   : > { %v1250_v54 = vadd.f32 1.0, %v2631_v20  ;;  %2378 = vmatprep.subr.bf16.mxu1 %v2377_v45  ;;  %2640 = vpow2.f32 %v2095_v18  ;;  %v3756_v8 = vpop.f32.mrb[6].mxu0  ;;  %v1471_v45 = vld [vmem:[%s3291_s8 + $0x10] sm:$0xff] }
 0x206   : > { %2642 = vrcp.f32 %v1249_v50  ;;  %v3750_v60 = vpop.f32.mrb[8].mxu1  ;;  %v3758_v12 = vpop.f32.mrb[7].mxu0 }
 0x207   : > { %v2633_v61 = vpop.eup %2632  ;;  %2644 = vrcp.f32 %v1250_v54  ;;  %v2099_v62 = vmul.f32 -1.442695, %v3750_v60  ;;  %v3753_v0 = vpop.f32.mrb[9].mxu1  ;;  %v1484_v54 = vld [vmem:[%s3291_s8 + $0x78] sm:$0xff] }
 0x208   : > { %v2635_v2 = vpop.eup %2634  ;;  %v1253_v5 = vadd.f32 1.0, %v2633_v61  ;;  %2646 = vpow2.f32 %v2096_v51  ;;  %v2100_v6 = vmul.f32 -1.442695, %v3753_v0  ;;  %v1480_v51 = vld [vmem:[%s3291_s8 + $0x58] sm:$0xff] }
 0x209   : > { %v1254_v11 = vadd.f32 1.0, %v2635_v2  ;;  %2648 = vpow2.f32 %v2099_v62  ;;  %v3766_v27 = vpop.f32.mrb[8].mxu0 }
 0x20a   : > { %2650 = vrcp.f32 %v1253_v5  ;;  %v3760_v13 = vpop.f32.mrb[10].mxu1  ;;  %v3770_v34 = vpop.f32.mrb[9].mxu0 }
 0x20b   : > { %v2637_v15 = vpop.eup %2636  ;;  %2652 = vrcp.f32 %v1254_v11  ;;  %v2103_v16 = vmul.f32 -1.442695, %v3760_v13  ;;  %v3763_v19 = vpop.f32.mrb[11].mxu1 }
 0x20c   : > { %v2639_v21 = vpop.eup %2638  ;;  %2380 = vmatpush1.bf16.xpose.msra.mxu1 %v2379_v3  ;;  %v1257_v23 = vadd.f32 1.0, %v2637_v15  ;;  %2654 = vpow2.f32 %v2100_v6  ;;  %v2104_v26 = vmul.f32 -1.442695, %v3763_v19 }
 0x20d   : > { %2382 = vmatprep.subr.bf16.mxu1 %v2381_v9  ;;  %v1258_v32 = vadd.f32 1.0, %v2639_v21  ;;  %2656 = vpow2.f32 %v2103_v16  ;;  %v3780_v47 = vpop.f32.mrb[10].mxu0  ;;  %v2455_v9 = vpack.c.bf16 %v1475_v10, %v1471_v45  ;;  %v2457_v16 = vpack.c.bf16 %v1484_v54, %v1480_v51  ;;  %v1492_v10 = vld [vmem:[%s3291_s8 + $0xb8] sm:$0xff] }
 0x20e   : > { %2658 = vrcp.f32 %v1257_v23  ;;  %v3774_v14 = vpop.f32.mrb[12].mxu1  ;;  %v3783_v63 = vpop.f32.mrb[11].mxu0  ;;  %v2387_v23 = vpack.c.bf16 %v877_v59, %v875_v58 }
 0x20f   : > { %v2641_v17 = vpop.eup %2640  ;;  %2660 = vrcp.f32 %v1258_v32  ;;  %v2107_v39 = vmul.f32 -1.442695, %v3774_v14  ;;  %v3777_v40 = vpop.f32.mrb[13].mxu1 }
 0x210   : > { %v2643_v31 = vpop.eup %2642  ;;  %v1261_v36 = vadd.f32 1.0, %v2641_v17  ;;  %2662 = vpow2.f32 %v2104_v26  ;;  %v2108_v41 = vmul.f32 -1.442695, %v3777_v40 }
 0x211   : > { %v2645_v49 = vpop.eup %2644  ;;  %v1369_v7 = vmul.f32 %v2643_v31, %v3702_v29  ;;  %2664 = vpow2.f32 %v2107_v39  ;;  %v3800_v6 = vpop.f32.mrb[12].mxu0 }
 0x212   : > { %v2647_v18 = vpop.eup %2646  ;;  %v1370_v20 = vmul.f32 %v2645_v49, %v3707_v35  ;;  %2666 = vrcp.f32 %v1261_v36  ;;  %v3788_v50 = vpop.f32.mrb[14].mxu1  ;;  %v1483_v49 = vld [vmem:[%s3291_s8 + $0x70] sm:$0xff] }
 0x213   : > { %v2649_v24 = vpop.eup %2648  ;;  %v1409_v55 = vmul.f32 %v1369_v7, %v3714_v25  ;;  %v1262_v29 = vadd.f32 1.0, %v2647_v18  ;;  %2668 = vpow2.f32 %v2108_v41  ;;  %v2111_v61 = vmul.f32 -1.442695, %v3788_v50  ;;  %v3796_v62 = vpop.f32.mrb[15].mxu1 }
 0x214   : > { %v2651_v2 = vpop.eup %2650  ;;  %v1410_v3 = vmul.f32 %v1370_v20, %v3719_v42  ;;  %2384 = vmatpush1.bf16.xpose.msra.mxu1 %v2383_v43  ;;  %v1265_v35 = vadd.f32 1.0, %v2649_v24  ;;  %v2112_v5 = vmul.f32 -1.442695, %v3796_v62  ;;  %v3803_v15 = vpop.f32.mrb[13].mxu0 }
 0x215   : > { %v2653_v11 = vpop.eup %2652  ;;  %2386 = vmatprep.subr.bf16.mxu1 %v2385_v57  ;;  %v1373_v25 = vmul.f32 %v2651_v2, %v3712_v22  ;;  %2670 = vrcp.f32 %v1262_v29  ;;  %v3814_v31 = vpop.f32.mrb[14].mxu0 }
 0x216   : > { %v2655_v21 = vpop.eup %2654  ;;  %1661 = vmatprep.mubr.f32.mxu0 %v1410_v3  ;;  %v1374_v42 = vmul.f32 %v2653_v11, %v3717_v33  ;;  %2672 = vrcp.f32 %v1265_v35  ;;  %v3806_v26 = vpop.f32.mrb[16].mxu1 }
 0x217   : > { %v2657_v28 = vpop.eup %2656  ;;  %1662 = vmatmul.mubr.f32.vlgmr.msra.gmra.mrb[20].mxu0 %v1409_v55  ;;  %v1266_v30 = vadd.f32 1.0, %v2655_v21  ;;  %2674 = vpow2.f32 %v2111_v61  ;;  %v2115_v32 = vmul.f32 -1.442695, %v3806_v26  ;;  %v1413_v22 = vmul.f32 %v1373_v25, %v3732_v1  ;;  %v3810_v37 = vpop.f32.mrb[17].mxu1  ;;  %v1479_v1 = vld [vmem:[%s3291_s8 + $0x50] sm:$0xff] }
 0x218   : > { %v2659_v38 = vpop.eup %2658  ;;  %v1269_v17 = vadd.f32 1.0, %v2657_v28  ;;  %2676 = vpow2.f32 %v2112_v5  ;;  %v2116_v33 = vmul.f32 -1.442695, %v3810_v37  ;;  %v1414_v39 = vmul.f32 %v1374_v42, %v3734_v46  ;;  %2456 = vmatpush1.bf16.xpose.msra.mxu0 %v2455_v9  ;;  %v3817_v41 = vpop.f32.mrb[15].mxu0  ;;  %v1488_v46 = vld [vmem:[%s3291_s8 + $0x98] sm:$0xff]  ;;  %v2789_v28 = vld [vmem:[#allocation3] sm:$0xff] }
 0x219   : > { %v2661_v43 = vpop.eup %2660  ;;  %v1377_v36 = vmul.f32 %v2659_v38, %v3726_v44  ;;  %2678 = vrcp.f32 %v1266_v30  ;;  %2458 = vmatprep.subr.bf16.mxu0 %v2457_v16  ;;  %v3831_v58 = vpop.f32.mrb[16].mxu0  ;;  %v2459_v59 = vpack.c.bf16 %v1483_v49, %v1479_v1  ;;  %v1491_v38 = vld [vmem:[%s3291_s8 + $0xb0] sm:$0xff] }
 0x21a   : > { %v2663_v7 = vpop.eup %2662  ;;  %v1378_v57 = vmul.f32 %v2661_v43, %v3729_v52  ;;  %2680 = vrcp.f32 %v1269_v17  ;;  %v3822_v45 = vpop.f32.mrb[18].mxu1  ;;  %1667 = vmatprep.mubr.f32.mxu0 %v1414_v39  ;;  %v1496_v39 = vld [vmem:[%s3291_s8 + $0xd8] sm:$0xff] }
 0x21b   : > { %v2665_v18 = vpop.eup %2664  ;;  %v1270_v20 = vadd.f32 1.0, %v2663_v7  ;;  %2682 = vpow2.f32 %v2115_v32  ;;  %v2119_v44 = vmul.f32 -1.442695, %v3822_v45  ;;  %v1417_v51 = vmul.f32 %v1377_v36, %v3742_v53  ;;  %v3828_v54 = vpop.f32.mrb[19].mxu1  ;;  %1668 = vmatmul.mubr.f32.gmra.mrb[22].mxu0 %v1413_v22  ;;  %v1487_v22 = vld [vmem:[%s3291_s8 + $0x90] sm:$0xff]  ;;  %v1500_v43 = vld [vmem:[%s3291_s8 + $0xf8] sm:$0xff] }
 0x21c   : > { %v2667_v24 = vpop.eup %2666  ;;  %2388 = vmatpush1.bf16.xpose.msra.mxu1 %v2387_v23  ;;  %v1273_v55 = vadd.f32 1.0, %v2665_v18  ;;  %2684 = vpow2.f32 %v2116_v33  ;;  %v1418_v52 = vmul.f32 %v1378_v57, %v3746_v56  ;;  %v2120_v2 = vmul.f32 -1.442695, %v3828_v54  ;;  %v3835_v3 = vpop.f32.mrb[17].mxu0 }
 0x21d   : > { %v2669_v29 = vpop.eup %2668  ;;  %v1381_v61 = vmul.f32 %v2667_v24, %v3736_v4  ;;  %2686 = vrcp.f32 %v1270_v20  ;;  %v2461_v53 = vpack.c.bf16 %v1492_v10, %v1488_v46  ;;  %v3839_v4 = vpop.f32.mrb[18].mxu0  ;;  %v2463_v7 = vpack.c.bf16 %v1491_v38, %v1487_v22  ;;  %v2791_v46 = vld [vmem:[#allocation3 + $0x10] sm:$0xff]  ;;  %v2798_v22 = vld [vmem:[#allocation3 + $0x58] sm:$0xff] }
 0x21e   : > { %2688 = vrcp.f32 %v1273_v55  ;;  %v1274_v35 = vadd.f32 1.0, %v2669_v29  ;;  %1673 = vmatprep.mubr.f32.mxu0 %v1418_v52  ;;  %v3842_v21 = vpop.f32.mrb[19].mxu0  ;;  %v2465_v18 = vpack.c.bf16 %v1500_v43, %v1496_v39  ;;  %v1516_v38 = vld [vmem:[%s3291_s8 + $0x178] sm:$0xff]  ;;  %v2799_v39 = vld [vmem:[#allocation3 + $0x50] sm:$0xff] }
 0x21f   : > { %v2671_v5 = vpop.eup %2670  ;;  %2690 = vpow2.f32 %v2119_v44  ;;  %v1421_v9 = vmul.f32 %v1381_v61, %v3756_v8  ;;  %1674 = vmatmul.mubr.f32.gmra.mrb[24].mxu0 %v1417_v51  ;;  %v2792_v44 = vld [vmem:[#allocation3 + $0x28] sm:$0xff]  ;;  %v1495_v61 = vld [vmem:[%s3291_s8 + $0xd0] sm:$0xff] }
 0x220   : > { %v2673_v56 = vpop.eup %2672  ;;  %v1382_v11 = vmul.f32 %v2671_v5, %v3739_v48  ;;  %2692 = vrcp.f32 %v1274_v35  ;;  %2460 = vmatpush1.bf16.xpose.msra.mxu0 %v2459_v59  ;;  %v2793_v59 = vld [vmem:[#allocation3 + $0x20] sm:$0xff]  ;;  %v1504_v35 = vld [vmem:[%s3291_s8 + $0x118] sm:$0xff] }
 0x221   : > { %v2675_v25 = vpop.eup %2674  ;;  %v1385_v16 = vmul.f32 %v2673_v56, %v3750_v60  ;;  %2694 = vpow2.f32 %v2120_v2  ;;  %2462 = vmatprep.subr.bf16.mxu0 %v2461_v53  ;;  %v2790_v60 = vld [vmem:[#allocation3 + $0x18] sm:$0xff]  ;;  %v1499_v2 = vld [vmem:[%s3291_s8 + $0xf0] sm:$0xff] }
 0x222   : > { %v2677_v23 = vpop.eup %2676  ;;  %v1277_v8 = vadd.f32 1.0, %v2675_v25  ;;  %v1422_v42 = vmul.f32 %v1382_v11, %v3758_v12  ;;  %v1508_v5 = vld [vmem:[%s3291_s8 + $0x138] sm:$0xff]  ;;  %v2467_v56 = vpack.c.bf16 %v1499_v2, %v1495_v61  ;;  %v1535_v61 = vld [vmem:[%s3291_s8 + $0x210] sm:$0xff] }
 0x223   : > { %v2679_v48 = vpop.eup %2678  ;;  %1069 = vmatmul.mubr.f32.vlgmr.msra.gmra.mrb[40].mxu1 %v2789_v28  ;;  %v1278_v30 = vadd.f32 1.0, %v2677_v23  ;;  %v1425_v32 = vmul.f32 %v1385_v16, %v3766_v27  ;;  %v2469_v25 = vpack.c.bf16 %v1508_v5, %v1504_v35  ;;  %v2796_v16 = vld [vmem:[#allocation3 + $0x48] sm:$0xff]  ;;  %v2797_v28 = vld [vmem:[#allocation3 + $0x40] sm:$0xff]  ;;  %v1539_v2 = vld [vmem:[%s3291_s8 + $0x230] sm:$0xff] }
 0x224   : > { %v2681_v17 = vpop.eup %2680  ;;  %1074 = vmatprep.mubr.f32.mxu1 %v2790_v60  ;;  %v1386_v33 = vmul.f32 %v2679_v48, %v3753_v0  ;;  %2696 = vrcp.f32 %v1277_v8  ;;  %1679 = vmatprep.mubr.f32.mxu0 %v1422_v42  ;;  %v2487_v35 = vpack.c.bf16 %v1539_v2, %v1535_v61 }
 0x225   : > { %v2683_v36 = vpop.eup %2682  ;;  %v1389_v12 = vmul.f32 %v2681_v17, %v3760_v13  ;;  %2698 = vrcp.f32 %v1278_v30  ;;  %1680 = vmatmul.mubr.f32.gmra.mrb[26].mxu0 %v1421_v9  ;;  %v1503_v30 = vld [vmem:[%s3291_s8 + $0x110] sm:$0xff] }
 0x226   : > { %v2685_v1 = vpop.eup %2684  ;;  %v1281_v49 = vadd.f32 1.0, %v2683_v36  ;;  %v1426_v27 = vmul.f32 %v1386_v33, %v3770_v34 }
 0x227   : > { %v2687_v57 = vpop.eup %2686  ;;  %1075 = vmatmul.mubr.f32.gmra.mrb[42].mxu1 %v2791_v46  ;;  %v1282_v10 = vadd.f32 1.0, %v2685_v1  ;;  %v1429_v0 = vmul.f32 %v1389_v12, %v3780_v47 }
 0x228   : > { %v2689_v20 = vpop.eup %2688  ;;  %1080 = vmatprep.mubr.f32.mxu1 %v2792_v44  ;;  %v1390_v51 = vmul.f32 %v2687_v57, %v3763_v19  ;;  %2700 = vrcp.f32 %v1281_v49  ;;  %1685 = vmatprep.mubr.f32.mxu0 %v1426_v27  ;;  %v1511_v49 = vld [vmem:[%s3291_s8 + $0x150] sm:$0xff]  ;;  %v2802_v27 = vld [vmem:[#allocation3 + $0x78] sm:$0xff] }
 0x229   : > { %v2691_v13 = vpop.eup %2690  ;;  %v1393_v34 = vmul.f32 %v2689_v20, %v3774_v14  ;;  %2702 = vrcp.f32 %v1282_v10  ;;  %1686 = vmatmul.mubr.f32.gmra.mrb[28].mxu0 %v1425_v32  ;;  %v2794_v14 = vld [vmem:[#allocation3 + $0x38] sm:$0xff]  ;;  %v1507_v32 = vld [vmem:[%s3291_s8 + $0x130] sm:$0xff]  ;;  %v2804_v10 = vld [vmem:[#allocation3 + $0x88] sm:$0xff] }
 0x22a   : > { %v2693_v24 = vpop.eup %2692  ;;  %v1285_v55 = vadd.f32 1.0, %v2691_v13  ;;  %v1430_v47 = vmul.f32 %v1390_v51, %v3783_v63  ;;  %2464 = vmatpush1.bf16.xpose.msra.mxu0 %v2463_v7  ;;  %v2471_v33 = vpack.c.bf16 %v1507_v32, %v1503_v30  ;;  %v1520_v7 = vld [vmem:[%s3291_s8 + $0x198] sm:$0xff] }
 0x22b   : > { %v2695_v52 = vpop.eup %2694  ;;  %1081 = vmatmul.mubr.f32.gmra.mrb[44].mxu1 %v2793_v59  ;;  %v1394_v19 = vmul.f32 %v2693_v24, %v3777_v40  ;;  %v1433_v29 = vmul.f32 %v1393_v34, %v3800_v6  ;;  %2466 = vmatprep.subr.bf16.mxu0 %v2465_v18  ;;  %v2795_v40 = vld [vmem:[#allocation3 + $0x30] sm:$0xff]  ;;  %v1524_v57 = vld [vmem:[%s3291_s8 + $0x1b8] sm:$0xff] }
 0x22c   : > { %1086 = vmatprep.mubr.f32.mxu1 %v2794_v14  ;;  %2704 = vrcp.f32 %v1285_v55  ;;  %v1286_v53 = vadd.f32 1.0, %v2695_v52  ;;  %1691 = vmatprep.mubr.f32.mxu0 %v1430_v47  ;;  %v2477_v46 = vpack.c.bf16 %v1524_v57, %v1520_v7  ;;  %v1523_v18 = vld [vmem:[%s3291_s8 + $0x1b0] sm:$0xff]  ;;  %v2806_v20 = vld [vmem:[#allocation3 + $0x98] sm:$0xff] }
 0x22d   : > { %v1434_v63 = vmul.f32 %v1394_v19, %v3803_v15  ;;  %1692 = vmatmul.mubr.f32.gmra.mrb[30].mxu0 %v1429_v0  ;;  %v1519_v0 = vld [vmem:[%s3291_s8 + $0x190] sm:$0xff]  ;;  %v1528_v44 = vld [vmem:[%s3291_s8 + $0x1d8] sm:$0xff] }
 0x22e   : > { %v2697_v9 = vpop.eup %2696  ;;  %2706 = vrcp.f32 %v1286_v53  ;;  %v1532_v51 = vld [vmem:[%s3291_s8 + $0x1f8] sm:$0xff]  ;;  %v2479_v13 = vpack.c.bf16 %v1523_v18, %v1519_v0  ;;  %v2807_v34 = vld [vmem:[#allocation3 + $0x90] sm:$0xff] }
 0x22f   : > { %v2699_v11 = vpop.eup %2698  ;;  %1087 = vmatmul.mubr.f32.gmra.mrb[46].mxu1 %v2795_v40  ;;  %v1397_v6 = vmul.f32 %v2697_v9, %v3788_v50  ;;  %1697 = vmatprep.mubr.f32.mxu0 %v1434_v63  ;;  %v2481_v24 = vpack.c.bf16 %v1532_v51, %v1528_v44  ;;  %v1527_v55 = vld [vmem:[%s3291_s8 + $0x1d0] sm:$0xff]  ;;  %v1536_v52 = vld [vmem:[%s3291_s8 + $0x218] sm:$0xff] }
 0x230   : > { %1092 = vmatprep.mubr.f32.mxu1 %v2796_v16  ;;  %v1398_v23 = vmul.f32 %v2699_v11, %v3796_v62  ;;  %v1531_v47 = vld [vmem:[%s3291_s8 + $0x1f0] sm:$0xff]  ;;  %v1540_v59 = vld [vmem:[%s3291_s8 + $0x238] sm:$0xff] }
 0x231   : > { %v1437_v8 = vmul.f32 %v1397_v6, %v3814_v31  ;;  %1698 = vmatmul.mubr.f32.gmra.mrb[32].mxu0 %v1433_v29  ;;  %v1512_v31 = vld [vmem:[%s3291_s8 + $0x158] sm:$0xff]  ;;  %v2483_v19 = vpack.c.bf16 %v1531_v47, %v1527_v55  ;;  %v2485_v29 = vpack.c.bf16 %v1540_v59, %v1536_v52  ;;  %v1543_v63 = vld [vmem:[%s3291_s8 + $0x250] sm:$0xff] }
 0x232   : > { %v2701_v15 = vpop.eup %2700  ;;  %v1438_v42 = vmul.f32 %v1398_v23, %v3817_v41  ;;  %2468 = vmatpush1.bf16.xpose.msra.mxu0 %v2467_v56  ;;  %v2473_v43 = vpack.c.bf16 %v1516_v38, %v1512_v31  ;;  %v1544_v14 = vld [vmem:[%s3291_s8 + $0x258] sm:$0xff]  ;;  %v1547_v9 = vld [vmem:[%s3291_s8 + $0x270] sm:$0xff] }
 0x233   : > { %v2703_v48 = vpop.eup %2702  ;;  %1093 = vmatmul.mubr.f32.gmra.mrb[48].mxu1 %v2797_v28  ;;  %v1401_v50 = vmul.f32 %v2701_v15, %v3806_v26  ;;  %2470 = vmatprep.subr.bf16.mxu0 %v2469_v25  ;;  %v1548_v53 = vld [vmem:[%s3291_s8 + $0x278] sm:$0xff]  ;;  %v2491_v40 = vpack.c.bf16 %v1547_v9, %v1543_v63  ;;  %v1551_v25 = vld [vmem:[%s3291_s8 + $0x290] sm:$0xff] }
 0x234   : > { %1098 = vmatprep.mubr.f32.mxu1 %v2798_v22  ;;  %v1402_v62 = vmul.f32 %v2703_v48, %v3810_v37  ;;  %1703 = vmatprep.mubr.f32.mxu0 %v1438_v42  ;;  %v2800_v37 = vld [vmem:[#allocation3 + $0x68] sm:$0xff]  ;;  %v2489_v5 = vpack.c.bf16 %v1548_v53, %v1544_v14  ;;  %v1552_v56 = vld [vmem:[%s3291_s8 + $0x298] sm:$0xff]  ;;  %v1555_v16 = vld [vmem:[%s3291_s8 + $0x2b0] sm:$0xff] }
 0x235   : > { %v1441_v17 = vmul.f32 %v1401_v50, %v3831_v58  ;;  %1704 = vmatmul.mubr.f32.gmra.mrb[34].mxu0 %v1437_v8  ;;  %v1556_v11 = vld [vmem:[%s3291_s8 + $0x2b8] sm:$0xff]  ;;  %v2495_v15 = vpack.c.bf16 %v1555_v16, %v1551_v25  ;;  %v1559_v48 = vld [vmem:[%s3291_s8 + $0x2d0] sm:$0xff] }
 0x236   : > { %v2705_v41 = vpop.eup %2704  ;;  %v1442_v60 = vmul.f32 %v1402_v62, %v3835_v3  ;;  %v2801_v3 = vld [vmem:[#allocation3 + $0x60] sm:$0xff]  ;;  %v2493_v6 = vpack.c.bf16 %v1556_v11, %v1552_v56  ;;  %v1560_v23 = vld [vmem:[%s3291_s8 + $0x2d8] sm:$0xff]  ;;  %v1563_v28 = vld [vmem:[%s3291_s8 + $0x2f0] sm:$0xff] }
 0x237   : > { %1099 = vmatmul.mubr.f32.gmra.mrb[50].mxu1 %v2799_v39  ;;  %v1405_v26 = vmul.f32 %v2705_v41, %v3822_v45  ;;  %v1515_v45 = vld [vmem:[%s3291_s8 + $0x170] sm:$0xff]  ;;  %v1564_v8 = vld [vmem:[%s3291_s8 + $0x2f8] sm:$0xff]  ;;  %v2499_v32 = vpack.c.bf16 %v1563_v28, %v1559_v48 }
 0x238   : > { %v2707_v36 = vpop.eup %2706  ;;  %1104 = vmatprep.mubr.f32.mxu1 %v2800_v37  ;;  %1709 = vmatprep.mubr.f32.mxu0 %v1442_v60  ;;  %v2497_v42 = vpack.c.bf16 %v1564_v8, %v1560_v23  ;;  %v1568_v50 = vld [vmem:[%s3291_s8 + $0x318] sm:$0xff]  ;;  %v1567_v62 = vld [vmem:[%s3291_s8 + $0x310] sm:$0xff] }
 0x239   : > { %v1406_v58 = vmul.f32 %v2707_v36, %v3828_v54  ;;  %v1445_v12 = vmul.f32 %v1405_v26, %v3839_v4  ;;  %1710 = vmatmul.mubr.f32.gmra.mrb[36].mxu0 %v1441_v17  ;;  %v2475_v54 = vpack.c.bf16 %v1515_v45, %v1511_v49  ;;  %v2803_v4 = vld [vmem:[#allocation3 + $0x70] sm:$0xff]  ;;  %v1572_v30 = vld [vmem:[%s3291_s8 + $0x338] sm:$0xff] }
 0x23a   : > { %2472 = vmatpush1.bf16.xpose.msra.mxu0 %v2471_v33  ;;  %v2501_v22 = vpack.c.bf16 %v1572_v30, %v1568_v50  ;;  %v1571_v31 = vld [vmem:[%s3291_s8 + $0x330] sm:$0xff]  ;;  %v1576_v38 = vld [vmem:[%s3291_s8 + $0x358] sm:$0xff] }
 0x23b   : > { %1105 = vmatmul.mubr.f32.gmra.mrb[52].mxu1 %v2801_v3  ;;  %v1446_v1 = vmul.f32 %v1406_v58, %v3842_v21  ;;  %2474 = vmatprep.subr.bf16.mxu0 %v2473_v43  ;;  %v2805_v21 = vld [vmem:[#allocation3 + $0x80] sm:$0xff]  ;;  %v1580_v17 = vld [vmem:[%s3291_s8 + $0x378] sm:$0xff]  ;;  %v2503_v60 = vpack.c.bf16 %v1571_v31, %v1567_v62  ;;  %v1575_v36 = vld [vmem:[%s3291_s8 + $0x350] sm:$0xff] }
 0x23c   : > { %1110 = vmatprep.mubr.f32.mxu1 %v2802_v27  ;;  %v2505_v39 = vpack.c.bf16 %v1580_v17, %v1576_v38  ;;  %v1579_v37 = vld [vmem:[%s3291_s8 + $0x370] sm:$0xff]  ;;  %v1584_v58 = vld [vmem:[%s3291_s8 + $0x398] sm:$0xff] }
 0x23d   : > { %1715 = vmatprep.mubr.f32.mxu0 %v1446_v1  ;;  %v2507_v1 = vpack.c.bf16 %v1579_v37, %v1575_v36  ;;  %v1583_v57 = vld [vmem:[%s3291_s8 + $0x390] sm:$0xff] }
 0x23e   : > { %1716 = vmatmul.mubr.f32.gmra.mrb[38].mxu0 %v1445_v12  ;;  %v1588_v12 = vld [vmem:[%s3291_s8 + $0x3b8] sm:$0xff]  ;;  %v1591_v51 = vld [vmem:[%s3291_s8 + $0x3d0] sm:$0xff] }
 0x23f   : > { %1111 = vmatmul.mubr.f32.gmra.mrb[54].mxu1 %v2803_v4  ;;  %v2509_v45 = vpack.c.bf16 %v1588_v12, %v1584_v58  ;;  %v1592_v4 = vld [vmem:[%s3291_s8 + $0x3d8] sm:$0xff] }
 0x240   : > { %1116 = vmatprep.mubr.f32.mxu1 %v2804_v10 }
 0x242   : > { %2476 = vmatpush1.bf16.xpose.msra.mxu0 %v2475_v54  ;;  %v1587_v54 = vld [vmem:[%s3291_s8 + $0x3b0] sm:$0xff] }
 0x243   : > { %1117 = vmatmul.mubr.f32.gmra.mrb[56].mxu1 %v2805_v21  ;;  %2478 = vmatprep.subr.bf16.mxu0 %v2477_v46  ;;  %v1596_v46 = vld [vmem:[%s3291_s8 + $0x3f8] sm:$0xff]  ;;  %v2511_v21 = vpack.c.bf16 %v1587_v54, %v1583_v57 }
 0x244   : > { %1122 = vmatprep.mubr.f32.mxu1 %v2806_v20  ;;  %v2513_v18 = vpack.c.bf16 %v1596_v46, %v1592_v4 }
 0x247   : > { %1123 = vmatmul.mubr.f32.gmra.mrb[58].mxu1 %v2807_v34 }
 0x24a   : > { %2480 = vmatpush1.bf16.xpose.msra.mxu0 %v2479_v13  ;;  %v1595_v13 = vld [vmem:[%s3291_s8 + $0x3f0] sm:$0xff] }
 0x24b   : > { %2482 = vmatprep.subr.bf16.mxu0 %v2481_v24  ;;  %v2515_v24 = vpack.c.bf16 %v1595_v13, %v1591_v51 }
 0x252   : > { %2484 = vmatpush1.bf16.xpose.msra.mxu0 %v2483_v19 }
 0x253   : > { %2486 = vmatprep.subr.bf16.mxu0 %v2485_v29 }
 0x25a   : > { %2488 = vmatpush1.bf16.xpose.msra.mxu0 %v2487_v35 }
 0x25b   : > { %2490 = vmatprep.subr.bf16.mxu0 %v2489_v5 }
 0x262   : > { %2492 = vmatpush1.bf16.xpose.msra.mxu0 %v2491_v40 }
 0x263   : > { %2494 = vmatprep.subr.bf16.mxu0 %v2493_v6 }
 0x26a   : > { %2496 = vmatpush1.bf16.xpose.msra.mxu0 %v2495_v15 }
 0x26b   : > { %2498 = vmatprep.subr.bf16.mxu0 %v2497_v42 }
 0x272   : > { %2500 = vmatpush1.bf16.xpose.msra.mxu0 %v2499_v32 }
 0x273   : > { %2502 = vmatprep.subr.bf16.mxu0 %v2501_v22 }
 0x276   : > { %v3912_v41 = vpop.f32.mrb[20].mxu1 }
 0x277   : > { %v3914_v33 = vpop.f32.mrb[21].mxu1  ;;  %v2085_v2 = vmul.f32 -1.442695, %v3912_v41 }
 0x278   : > { %v2086_v14 = vmul.f32 -1.442695, %v3914_v33 }
 0x279   : > { %2708 = vpow2.f32 %v2085_v2 }
 0x27a   : > { %v3916_v26 = vpop.f32.mrb[22].mxu1  ;;  %2504 = vmatpush1.bf16.xpose.msra.mxu0 %v2503_v60  ;;  %2710 = vpow2.f32 %v2086_v14 }
 0x27b   : > { %v3918_v43 = vpop.f32.mrb[23].mxu1  ;;  %2506 = vmatprep.subr.bf16.mxu0 %v2505_v39  ;;  %v2089_v53 = vmul.f32 -1.442695, %v3916_v26 }
 0x27c   : > { %v2090_v35 = vmul.f32 -1.442695, %v3918_v43 }
 0x27d   : > { %2712 = vpow2.f32 %v2089_v53 }
 0x27e   : > { %v3924_v3 = vpop.f32.mrb[24].mxu1  ;;  %2714 = vpow2.f32 %v2090_v35 }
 0x27f   : > { %v3926_v49 = vpop.f32.mrb[25].mxu1  ;;  %v2093_v5 = vmul.f32 -1.442695, %v3924_v3 }
 0x280   : > { %v2094_v63 = vmul.f32 -1.442695, %v3926_v49 }
 0x281   : > { %2716 = vpow2.f32 %v2093_v5 }
 0x282   : > { %v3928_v27 = vpop.f32.mrb[26].mxu1  ;;  %2508 = vmatpush1.bf16.xpose.msra.mxu0 %v2507_v1  ;;  %2718 = vpow2.f32 %v2094_v63 }
 0x283   : > { %v3930_v7 = vpop.f32.mrb[27].mxu1  ;;  %2510 = vmatprep.subr.bf16.mxu0 %v2509_v45  ;;  %v2097_v9 = vmul.f32 -1.442695, %v3928_v27  ;;  %v2709_v56 = vpop.eup %2708 }
 0x284   : > { %v2711_v11 = vpop.eup %2710  ;;  %v2098_v40 = vmul.f32 -1.442695, %v3930_v7  ;;  %v1251_v25 = vadd.f32 1.0, %v2709_v56 }
 0x285   : > { %2720 = vpow2.f32 %v2097_v9  ;;  %v1252_v16 = vadd.f32 1.0, %v2711_v11 }
 0x286   : > { %v3936_v10 = vpop.f32.mrb[28].mxu1  ;;  %2722 = vpow2.f32 %v2098_v40 }
 0x287   : > { %v3938_v0 = vpop.f32.mrb[29].mxu1  ;;  %v2101_v6 = vmul.f32 -1.442695, %v3936_v10  ;;  %v2713_v23 = vpop.eup %2712 }
 0x288   : > { %v2102_v8 = vmul.f32 -1.442695, %v3938_v0  ;;  %v2715_v42 = vpop.eup %2714  ;;  %v1255_v28 = vadd.f32 1.0, %v2713_v23 }
 0x289   : > { %2724 = vpow2.f32 %v2101_v6  ;;  %v1256_v30 = vadd.f32 1.0, %v2715_v42 }
 0x28a   : > { %v3940_v20 = vpop.f32.mrb[30].mxu1  ;;  %2512 = vmatpush1.bf16.xpose.msra.mxu0 %v2511_v21  ;;  %2726 = vrcp.f32 %v1251_v25 }
 0x28b   : > { %v3942_v44 = vpop.f32.mrb[31].mxu1  ;;  %2514 = vmatprep.subr.bf16.mxu0 %v2513_v18  ;;  %v2105_v15 = vmul.f32 -1.442695, %v3940_v20  ;;  %v2717_v48 = vpop.eup %2716  ;;  %2728 = vrcp.f32 %v1252_v16 }
 0x28c   : > { %2730 = vpow2.f32 %v2102_v8  ;;  %v2106_v50 = vmul.f32 -1.442695, %v3942_v44  ;;  %v2719_v32 = vpop.eup %2718  ;;  %v1259_v22 = vadd.f32 1.0, %v2717_v48 }
 0x28d   : > { %2732 = vpow2.f32 %v2105_v15  ;;  %v1260_v17 = vadd.f32 1.0, %v2719_v32 }
 0x28e   : > { %v3946_v34 = vpop.f32.mrb[32].mxu1  ;;  %2734 = vrcp.f32 %v1255_v28 }
 0x28f   : > { %v3948_v55 = vpop.f32.mrb[33].mxu1  ;;  %v2721_v62 = vpop.eup %2720  ;;  %v2109_v31 = vmul.f32 -1.442695, %v3946_v34  ;;  %2736 = vpow2.f32 %v2106_v50 }
 0x290   : > { %v2110_v38 = vmul.f32 -1.442695, %v3948_v55  ;;  %2738 = vrcp.f32 %v1256_v30  ;;  %v2723_v60 = vpop.eup %2722  ;;  %v1263_v39 = vadd.f32 1.0, %v2721_v62 }
 0x291   : > { %2740 = vrcp.f32 %v1259_v22  ;;  %v1264_v45 = vadd.f32 1.0, %v2723_v60 }
 0x292   : > { %v3950_v47 = vpop.f32.mrb[34].mxu1  ;;  %2516 = vmatpush1.bf16.xpose.msra.mxu0 %v2515_v24  ;;  %2742 = vpow2.f32 %v2109_v31 }
 0x293   : > { %v3952_v52 = vpop.f32.mrb[35].mxu1  ;;  %v2725_v36 = vpop.eup %2724  ;;  %v2113_v37 = vmul.f32 -1.442695, %v3950_v47  ;;  %2744 = vpow2.f32 %v2110_v38 }
 0x294   : > { %v2727_v58 = vpop.eup %2726  ;;  %v2114_v12 = vmul.f32 -1.442695, %v3952_v52  ;;  %2746 = vrcp.f32 %v1260_v17  ;;  %v1267_v54 = vadd.f32 1.0, %v2725_v36 }
 0x295   : > { %v2729_v1 = vpop.eup %2728  ;;  %2748 = vrcp.f32 %v1263_v39  ;;  %v1371_v51 = vmul.f32 %v2727_v58, %v3912_v41 }
 0x296   : > { %v3954_v59 = vpop.f32.mrb[36].mxu1  ;;  %v2731_v57 = vpop.eup %2730  ;;  %2750 = vpow2.f32 %v2113_v37  ;;  %v1372_v2 = vmul.f32 %v2729_v1, %v3914_v33 }
 0x297   : > { %v3956_v19 = vpop.f32.mrb[37].mxu1  ;;  %v2733_v4 = vpop.eup %2732  ;;  %v2117_v46 = vmul.f32 -1.442695, %v3954_v59  ;;  %2752 = vpow2.f32 %v2114_v12  ;;  %v1268_v13 = vadd.f32 1.0, %v2731_v57 }
 0x298   : > { %v2118_v21 = vmul.f32 -1.442695, %v3956_v19  ;;  %v2735_v18 = vpop.eup %2734  ;;  %2754 = vrcp.f32 %v1264_v45  ;;  %v1271_v14 = vadd.f32 1.0, %v2733_v4 }
 0x299   : > { %v2737_v24 = vpop.eup %2736  ;;  %2756 = vrcp.f32 %v1267_v54  ;;  %v1375_v6 = vmul.f32 %v2735_v18, %v3916_v26 }
 0x29a   : > { %v3958_v29 = vpop.f32.mrb[38].mxu1  ;;  %v2739_v35 = vpop.eup %2738  ;;  %2758 = vpow2.f32 %v2117_v46  ;;  %v1272_v25 = vadd.f32 1.0, %v2737_v24 }
 0x29b   : > { %v3960_v61 = vpop.f32.mrb[39].mxu1  ;;  %v2121_v5 = vmul.f32 -1.442695, %v3958_v29  ;;  %v2741_v56 = vpop.eup %2740  ;;  %2760 = vpow2.f32 %v2118_v21  ;;  %v1376_v16 = vmul.f32 %v2739_v35, %v3918_v43 }
 0x29c   : > { %v2122_v11 = vmul.f32 -1.442695, %v3960_v61  ;;  %v2743_v41 = vpop.eup %2742  ;;  %2762 = vrcp.f32 %v1268_v13  ;;  %v1379_v26 = vmul.f32 %v2741_v56, %v3924_v3 }
 0x29d   : > { %v2745_v33 = vpop.eup %2744  ;;  %2764 = vrcp.f32 %v1271_v14  ;;  %v1275_v28 = vadd.f32 1.0, %v2743_v41 }
 0x29e   : > { %v2747_v8 = vpop.eup %2746  ;;  %2766 = vpow2.f32 %v2121_v5  ;;  %v1276_v32 = vadd.f32 1.0, %v2745_v33 }
 0x29f   : > { %v2749_v48 = vpop.eup %2748  ;;  %2768 = vpow2.f32 %v2122_v11  ;;  %v1380_v43 = vmul.f32 %v2747_v8, %v3926_v49 }
 0x2a0   : > { %v2751_v30 = vpop.eup %2750  ;;  %2770 = vrcp.f32 %v1272_v25  ;;  %v1383_v58 = vmul.f32 %v2749_v48, %v3928_v27 }
 0x2a1   : > { %v2753_v22 = vpop.eup %2752  ;;  %2772 = vrcp.f32 %v1275_v28  ;;  %v1279_v39 = vadd.f32 1.0, %v2751_v30 }
 0x2a2   : > { %v2755_v31 = vpop.eup %2754  ;;  %2774 = vrcp.f32 %v1276_v32  ;;  %v1280_v3 = vadd.f32 1.0, %v2753_v22 }
 0x2a3   : > { %v2757_v60 = vpop.eup %2756  ;;  %v1384_v1 = vmul.f32 %v2755_v31, %v3930_v7  ;;  %2776 = vrcp.f32 %v1279_v39 }
 0x2a4   : > { %v2759_v37 = vpop.eup %2758  ;;  %2778 = vrcp.f32 %v1280_v3 }
 0x2a5   : > { %v2761_v12 = vpop.eup %2760  ;;  %v1283_v46 = vadd.f32 1.0, %v2759_v37 }
 0x2a6   : > { %v2763_v49 = vpop.eup %2762  ;;  %v1284_v27 = vadd.f32 1.0, %v2761_v12 }
 0x2a7   : > { %v2765_v4 = vpop.eup %2764  ;;  %v1388_v24 = vmul.f32 %v2763_v49, %v3938_v0  ;;  %2780 = vrcp.f32 %v1283_v46  ;;  %v1451_v49 = vld [vmem:[#allocation2 + $0x10] sm:$0xff]  ;;  %v1453_v46 = vld [vmem:[#allocation2 + $0x20] sm:$0xff] }
 0x2a8   : > { %v2767_v18 = vpop.eup %2766  ;;  %2782 = vrcp.f32 %v1284_v27 }
 0x2a9   : > { %v2769_v13 = vpop.eup %2768  ;;  %v1287_v35 = vadd.f32 1.0, %v2767_v18 }
 0x2aa   : > { %v2771_v7 = vpop.eup %2770 }
 0x2ab   : > { %v2773_v56 = vpop.eup %2772  ;;  %2784 = vrcp.f32 %v1287_v35 }
 0x2ac   : > { %v1395_v25 = vmul.f32 %v2773_v56, %v3946_v34 }
 0x2f6   : > { %v1070_v53 = vpop.f32.mrb[40].mxu1 }
 0x2f7   : > { %v1411_v63 = vmul.f32 %v1371_v51, %v1070_v53  ;;  %v1072_v9 = vpop.f32.mrb[41].mxu1  ;;  %v1387_v51 = vmul.f32 %v2757_v60, %v3936_v10  ;;  %v1392_v10 = vmul.f32 %v2771_v7, %v3942_v44 }
 0x2f8   : > { %v1412_v40 = vmul.f32 %v1372_v2, %v1072_v9  ;;  %v1288_v9 = vadd.f32 1.0, %v2769_v13 }
 0x2fa   : > { %v1076_v23 = vpop.f32.mrb[42].mxu1  ;;  %1786 = vmatprep.mubr.f32.mxu0 %v1412_v40  ;;  %v2775_v40 = vpop.eup %2774  ;;  %2786 = vrcp.f32 %v1288_v9 }
 0x2fb   : > { %v1415_v15 = vmul.f32 %v1375_v6, %v1076_v23  ;;  %v1078_v42 = vpop.f32.mrb[43].mxu1  ;;  %1787 = vmatmul.mubr.f32.vlgmr.msra.gmra.mrb[20].mxu0 %v1411_v63  ;;  %v1391_v63 = vmul.f32 %v2765_v4, %v3940_v20  ;;  %v2777_v33 = vpop.eup %2776 }
 0x2fc   : > { %v1416_v50 = vmul.f32 %v1376_v16, %v1078_v42  ;;  %v1396_v16 = vmul.f32 %v2775_v40, %v3948_v55  ;;  %v2779_v23 = vpop.eup %2778  ;;  %v1399_v42 = vmul.f32 %v2777_v33, %v3950_v47  ;;  %v1459_v40 = vld [vmem:[#allocation2 + $0x50] sm:$0xff] }
 0x2fd   : > { %v2781_v48 = vpop.eup %2780  ;;  %v1400_v28 = vmul.f32 %v2779_v23, %v3952_v52 }
 0x2fe   : > { %v1082_v62 = vpop.f32.mrb[44].mxu1  ;;  %1792 = vmatprep.mubr.f32.mxu0 %v1416_v50  ;;  %v2783_v30 = vpop.eup %2782  ;;  %v1403_v55 = vmul.f32 %v2781_v48, %v3954_v59  ;;  %v1464_v48 = vld [vmem:[#allocation2 + $0x78] sm:$0xff] }
 0x2ff   : > { %v1419_v38 = vmul.f32 %v1379_v26, %v1082_v62  ;;  %v1084_v17 = vpop.f32.mrb[45].mxu1  ;;  %1793 = vmatmul.mubr.f32.gmra.mrb[22].mxu0 %v1415_v15  ;;  %v2785_v22 = vpop.eup %2784 }
 0x300   : > { %v1420_v36 = vmul.f32 %v1380_v43, %v1084_v17  ;;  %v1404_v43 = vmul.f32 %v2783_v30, %v3956_v19  ;;  %v1407_v52 = vmul.f32 %v2785_v22, %v3958_v29  ;;  %v1449_v19 = vld [vmem:[#allocation2] sm:$0xff] }
 0x302   : > { %v1088_v45 = vpop.f32.mrb[46].mxu1  ;;  %1798 = vmatprep.mubr.f32.mxu0 %v1420_v36 }
 0x303   : > { %v1423_v57 = vmul.f32 %v1383_v58, %v1088_v45  ;;  %v1090_v54 = vpop.f32.mrb[47].mxu1  ;;  %1799 = vmatmul.mubr.f32.gmra.mrb[24].mxu0 %v1419_v38  ;;  %v1450_v58 = vld [vmem:[#allocation2 + $0x8] sm:$0xff] }
 0x304   : > { %v1424_v21 = vmul.f32 %v1384_v1, %v1090_v54  ;;  %v2787_v31 = vpop.eup %2786 }
 0x305   : > { %v1408_v60 = vmul.f32 %v2787_v31, %v3960_v61  ;;  %v1467_v31 = vld [vmem:[#allocation2 + $0x90] sm:$0xff] }
 0x306   : > { %v1094_v2 = vpop.f32.mrb[48].mxu1  ;;  %1804 = vmatprep.mubr.f32.mxu0 %v1424_v21  ;;  %v1454_v21 = vld [vmem:[#allocation2 + $0x28] sm:$0xff] }
 0x307   : > { %v1427_v14 = vmul.f32 %v1387_v51, %v1094_v2  ;;  %v1096_v53 = vpop.f32.mrb[49].mxu1  ;;  %1805 = vmatmul.mubr.f32.gmra.mrb[26].mxu0 %v1423_v57  ;;  %v1452_v57 = vld [vmem:[#allocation2 + $0x18] sm:$0xff] }
 0x308   : > { %v1428_v5 = vmul.f32 %v1388_v24, %v1096_v53  ;;  %v1455_v24 = vld [vmem:[#allocation2 + $0x30] sm:$0xff]  ;;  %v1456_v2 = vld [vmem:[#allocation2 + $0x38] sm:$0xff] }
 0x30a   : > { %v1100_v11 = vpop.f32.mrb[50].mxu1  ;;  %1810 = vmatprep.mubr.f32.mxu0 %v1428_v5  ;;  %v1457_v5 = vld [vmem:[#allocation2 + $0x40] sm:$0xff] }
 0x30b   : > { %v1431_v0 = vmul.f32 %v1391_v63, %v1100_v11  ;;  %v1102_v41 = vpop.f32.mrb[51].mxu1  ;;  %1811 = vmatmul.mubr.f32.gmra.mrb[28].mxu0 %v1427_v14  ;;  %v1458_v63 = vld [vmem:[#allocation2 + $0x48] sm:$0xff] }
 0x30c   : > { %v1432_v6 = vmul.f32 %v1392_v10, %v1102_v41 }
 0x30e   : > { %v1106_v20 = vpop.f32.mrb[52].mxu1  ;;  %1816 = vmatprep.mubr.f32.mxu0 %v1432_v6 }
 0x30f   : > { %v1435_v8 = vmul.f32 %v1395_v25, %v1106_v20  ;;  %v1108_v15 = vpop.f32.mrb[53].mxu1  ;;  %1817 = vmatmul.mubr.f32.gmra.mrb[30].mxu0 %v1431_v0  ;;  %v1460_v0 = vld [vmem:[#allocation2 + $0x58] sm:$0xff]  ;;  %v1462_v20 = vld [vmem:[#allocation2 + $0x68] sm:$0xff] }
 0x310   : > { %v1436_v44 = vmul.f32 %v1396_v16, %v1108_v15  ;;  %v1461_v16 = vld [vmem:[#allocation2 + $0x60] sm:$0xff] }
 0x312   : > { %v1112_v50 = vpop.f32.mrb[54].mxu1  ;;  %1822 = vmatprep.mubr.f32.mxu0 %v1436_v44 }
 0x313   : > { %v1439_v34 = vmul.f32 %v1399_v42, %v1112_v50  ;;  %v1114_v26 = vpop.f32.mrb[55].mxu1  ;;  %1823 = vmatmul.mubr.f32.gmra.mrb[32].mxu0 %v1435_v8  ;;  %v1463_v42 = vld [vmem:[#allocation2 + $0x70] sm:$0xff] }
 0x314   : > { %v1440_v32 = vmul.f32 %v1400_v28, %v1114_v26  ;;  %v1465_v26 = vld [vmem:[#allocation2 + $0x80] sm:$0xff] }
 0x316   : > { %v1118_v62 = vpop.f32.mrb[56].mxu1  ;;  %1828 = vmatprep.mubr.f32.mxu0 %v1440_v32  ;;  %v1466_v32 = vld [vmem:[#allocation2 + $0x88] sm:$0xff] }
 0x317   : > { %v1443_v38 = vmul.f32 %v1403_v55, %v1118_v62  ;;  %v1120_v47 = vpop.f32.mrb[57].mxu1  ;;  %1829 = vmatmul.mubr.f32.gmra.mrb[34].mxu0 %v1439_v34 }
 0x318   : > { %v1444_v17 = vmul.f32 %v1404_v43, %v1120_v47 }
 0x31a   : > { %v1124_v39 = vpop.f32.mrb[58].mxu1  ;;  %1834 = vmatprep.mubr.f32.mxu0 %v1444_v17 }
 0x31b   : > { %v1447_v36 = vmul.f32 %v1407_v52, %v1124_v39  ;;  %v1126_v37 = vpop.f32.mrb[59].mxu1  ;;  %1835 = vmatmul.mubr.f32.gmra.mrb[36].mxu0 %v1443_v38  ;;  %v1468_v38 = vld [vmem:[#allocation2 + $0x98] sm:$0xff] }
 0x31c   : > { %v1448_v59 = vmul.f32 %v1408_v60, %v1126_v37 }
 0x31e   : > { %1840 = vmatprep.mubr.f32.mxu0 %v1448_v59 }
 0x31f   : > { %1841 = vmatmul.mubr.f32.gmra.mrb[38].mxu0 %v1447_v36 }
 0x3ce   : > { %v1788_v3 = vpop.f32.mrb[20].mxu0 }
 0x3cf   : > { %v1847_v12 = vadd.f32 %v1788_v3, %v1449_v19  ;;  %v1790_v1 = vpop.f32.mrb[21].mxu0 }
 0x3d0   : > { %v1848_v45 = vadd.f32 %v1790_v1, %v1450_v58 }
 0x3d1   : > { %1867 = vst [vmem:[#allocation2] sm:$0xff] %v1847_v12 }
 0x3d2   : > { %1868 = vst [vmem:[#allocation2 + $0x8] sm:$0xff] %v1848_v45  ;;  %v1794_v29 = vpop.f32.mrb[22].mxu0 }
 0x3d3   : > { %v1849_v61 = vadd.f32 %v1794_v29, %v1451_v49  ;;  %v1796_v54 = vpop.f32.mrb[23].mxu0 }
 0x3d4   : > { %v1850_v4 = vadd.f32 %v1796_v54, %v1452_v57 }
 0x3d5   : > { %1869 = vst [vmem:[#allocation2 + $0x10] sm:$0xff] %v1849_v61 }
 0x3d6   : > { %1870 = vst [vmem:[#allocation2 + $0x18] sm:$0xff] %v1850_v4  ;;  %v1800_v18 = vpop.f32.mrb[24].mxu0 }
 0x3d7   : > { %v1851_v51 = vadd.f32 %v1800_v18, %v1453_v46  ;;  %v1802_v27 = vpop.f32.mrb[25].mxu0 }
 0x3d8   : > { %v1852_v13 = vadd.f32 %v1802_v27, %v1454_v21  ;;  %v1891_v39 = vld [vmem:[#allocation2] sm:$0xff] (!%p2123_p4) }
 0x3d9   : > { %1871 = vst [vmem:[#allocation2 + $0x20] sm:$0xff] %v1851_v51  ;;  %v1892_v36 = vld [vmem:[#allocation2 + $0x8] sm:$0xff] (!%p2123_p4)  ;;  %1911 = vst [vmem:[#allocation11] sm:$0xff] (!%p2123_p4), %v1891_v39 }
 0x3da   : > { %1872 = vst [vmem:[#allocation2 + $0x28] sm:$0xff] %v1852_v13  ;;  %v1806_v7 = vpop.f32.mrb[26].mxu0  ;;  %1912 = vst [vmem:[#allocation11 + $0x8] sm:$0xff] (!%p2123_p4), %v1892_v36 }
 0x3db   : > { %v1853_v14 = vadd.f32 %v1806_v7, %v1455_v24  ;;  %v1808_v53 = vpop.f32.mrb[27].mxu0 }
 0x3dc   : > { %v1854_v35 = vadd.f32 %v1808_v53, %v1456_v2  ;;  %v1893_v37 = vld [vmem:[#allocation2 + $0x10] sm:$0xff] (!%p2123_p4) }
 0x3dd   : > { %1873 = vst [vmem:[#allocation2 + $0x30] sm:$0xff] %v1853_v14  ;;  %1913 = vst [vmem:[#allocation11 + $0x10] sm:$0xff] (!%p2123_p4), %v1893_v37  ;;  %v1894_v59 = vld [vmem:[#allocation2 + $0x18] sm:$0xff] (!%p2123_p4) }
 0x3de   : > { %1874 = vst [vmem:[#allocation2 + $0x38] sm:$0xff] %v1854_v35  ;;  %v1812_v9 = vpop.f32.mrb[28].mxu0  ;;  %1914 = vst [vmem:[#allocation11 + $0x18] sm:$0xff] (!%p2123_p4), %v1894_v59 }
 0x3df   : > { %v1855_v56 = vadd.f32 %v1812_v9, %v1457_v5  ;;  %v1814_v10 = vpop.f32.mrb[29].mxu0 }
 0x3e0   : > { %v1856_v11 = vadd.f32 %v1814_v10, %v1458_v63  ;;  %v1895_v19 = vld [vmem:[#allocation2 + $0x20] sm:$0xff] (!%p2123_p4) }
 0x3e1   : > { %1875 = vst [vmem:[#allocation2 + $0x40] sm:$0xff] %v1855_v56  ;;  %v1896_v58 = vld [vmem:[#allocation2 + $0x28] sm:$0xff] (!%p2123_p4)  ;;  %1915 = vst [vmem:[#allocation11 + $0x20] sm:$0xff] (!%p2123_p4), %v1895_v19 }
 0x3e2   : > { %1876 = vst [vmem:[#allocation2 + $0x48] sm:$0xff] %v1856_v11  ;;  %v1818_v41 = vpop.f32.mrb[30].mxu0  ;;  %1916 = vst [vmem:[#allocation11 + $0x28] sm:$0xff] (!%p2123_p4), %v1896_v58 }
 0x3e3   : > { %v1857_v6 = vadd.f32 %v1818_v41, %v1459_v40  ;;  %v1820_v25 = vpop.f32.mrb[31].mxu0 }
 0x3e4   : > { %v1858_v33 = vadd.f32 %v1820_v25, %v1460_v0  ;;  %v1897_v3 = vld [vmem:[#allocation2 + $0x30] sm:$0xff] (!%p2123_p4) }
 0x3e5   : > { %1877 = vst [vmem:[#allocation2 + $0x50] sm:$0xff] %v1857_v6  ;;  %v1898_v12 = vld [vmem:[#allocation2 + $0x38] sm:$0xff] (!%p2123_p4)  ;;  %1917 = vst [vmem:[#allocation11 + $0x30] sm:$0xff] (!%p2123_p4), %v1897_v3 }
 0x3e6   : > { %1878 = vst [vmem:[#allocation2 + $0x58] sm:$0xff] %v1858_v33  ;;  %v1824_v23 = vpop.f32.mrb[32].mxu0  ;;  %1918 = vst [vmem:[#allocation11 + $0x38] sm:$0xff] (!%p2123_p4), %v1898_v12 }
 0x3e7   : > { %v1859_v8 = vadd.f32 %v1824_v23, %v1461_v16  ;;  %v1826_v15 = vpop.f32.mrb[33].mxu0 }
 0x3e8   : > { %v1860_v44 = vadd.f32 %v1826_v15, %v1462_v20  ;;  %v1899_v1 = vld [vmem:[#allocation2 + $0x40] sm:$0xff] (!%p2123_p4) }
 0x3e9   : > { %1879 = vst [vmem:[#allocation2 + $0x60] sm:$0xff] %v1859_v8  ;;  %1919 = vst [vmem:[#allocation11 + $0x40] sm:$0xff] (!%p2123_p4), %v1899_v1  ;;  %v1900_v45 = vld [vmem:[#allocation2 + $0x48] sm:$0xff] (!%p2123_p4) }
 0x3ea   : > { %1880 = vst [vmem:[#allocation2 + $0x68] sm:$0xff] %v1860_v44  ;;  %v1830_v28 = vpop.f32.mrb[34].mxu0  ;;  %1920 = vst [vmem:[#allocation11 + $0x48] sm:$0xff] (!%p2123_p4), %v1900_v45 }
 0x3eb   : > { %v1861_v50 = vadd.f32 %v1830_v28, %v1463_v42  ;;  %v1832_v30 = vpop.f32.mrb[35].mxu0 }
 0x3ec   : > { %v1862_v34 = vadd.f32 %v1832_v30, %v1464_v48  ;;  %v1901_v49 = vld [vmem:[#allocation2 + $0x50] sm:$0xff] (!%p2123_p4) }
 0x3ed   : > { %1881 = vst [vmem:[#allocation2 + $0x70] sm:$0xff] %v1861_v50  ;;  %v1902_v57 = vld [vmem:[#allocation2 + $0x58] sm:$0xff] (!%p2123_p4)  ;;  %1921 = vst [vmem:[#allocation11 + $0x50] sm:$0xff] (!%p2123_p4), %v1901_v49 }
 0x3ee   : > { %1882 = vst [vmem:[#allocation2 + $0x78] sm:$0xff] %v1862_v34  ;;  %v1836_v55 = vpop.f32.mrb[36].mxu0  ;;  %1922 = vst [vmem:[#allocation11 + $0x58] sm:$0xff] (!%p2123_p4), %v1902_v57 }
 0x3ef   : > { %v1863_v22 = vadd.f32 %v1836_v55, %v1465_v26  ;;  %v1838_v43 = vpop.f32.mrb[37].mxu0 }
 0x3f0   : > { %v1864_v62 = vadd.f32 %v1838_v43, %v1466_v32  ;;  %1890 = sbr.rel (%p2123_p4) target bundleno = 1023 (0x3ff), region = 60  ;;  %v1903_v29 = vld [vmem:[#allocation2 + $0x60] sm:$0xff] (!%p2123_p4) }
 0x3f1   : > { %1883 = vst [vmem:[#allocation2 + $0x80] sm:$0xff] %v1863_v22  ;;  %v1904_v61 = vld [vmem:[#allocation2 + $0x68] sm:$0xff] (!%p2123_p4)  ;;  %1923 = vst [vmem:[#allocation11 + $0x60] sm:$0xff] (!%p2123_p4), %v1903_v29 }
 0x3f2   : > { %1884 = vst [vmem:[#allocation2 + $0x88] sm:$0xff] %v1864_v62  ;;  %v1842_v47 = vpop.f32.mrb[38].mxu0  ;;  %1924 = vst [vmem:[#allocation11 + $0x68] sm:$0xff] (!%p2123_p4), %v1904_v61 }
 0x3f3   : > { %v1865_v17 = vadd.f32 %v1842_v47, %v1467_v31  ;;  %v1844_v52 = vpop.f32.mrb[39].mxu0 }
 0x3f4   : > { %v1866_v60 = vadd.f32 %v1844_v52, %v1468_v38  ;;  %v1905_v54 = vld [vmem:[#allocation2 + $0x70] sm:$0xff] (!%p2123_p4) }
 0x3f5   : > { %1885 = vst [vmem:[#allocation2 + $0x90] sm:$0xff] %v1865_v17  ;;  %1925 = vst [vmem:[#allocation11 + $0x70] sm:$0xff] (!%p2123_p4), %v1905_v54  ;;  %v1906_v4 = vld [vmem:[#allocation2 + $0x78] sm:$0xff] (!%p2123_p4) }
 0x3f6   : > { %1886 = vst [vmem:[#allocation2 + $0x98] sm:$0xff] %v1866_v60  ;;  %1926 = vst [vmem:[#allocation11 + $0x78] sm:$0xff] (!%p2123_p4), %v1906_v4 }
 0x3f8   : > { %v1907_v46 = vld [vmem:[#allocation2 + $0x80] sm:$0xff] }
 0x3f9   : > { %v1908_v21 = vld [vmem:[#allocation2 + $0x88] sm:$0xff]  ;;  %1927 = vst [vmem:[#allocation11 + $0x80] sm:$0xff] %v1907_v46 }
 0x3fa   : > { %1928 = vst [vmem:[#allocation11 + $0x88] sm:$0xff] %v1908_v21 }
 0x3fc   : > { %v1909_v18 = vld [vmem:[#allocation2 + $0x90] sm:$0xff] }
 0x3fd   : > { %v1910_v51 = vld [vmem:[#allocation2 + $0x98] sm:$0xff]  ;;  %1929 = vst [vmem:[#allocation11 + $0x90] sm:$0xff] %v1909_v18 }
 0x3fe   : > { %1930 = vst [vmem:[#allocation11 + $0x98] sm:$0xff] %v1910_v51 }
 0x3ff PF: > { %p2568_p7 = scmp.eq.s32.totalorder %s3161_s24, 1  ;;  %s3026_s18 = smov [#allocation11]  }
 0x400   : > { %s1941_s30 = sshll.u32 %s3026_s18, 4  ;;  %s1942_s30 = int_to_ptr.vmem [resolvable:$true] %s1941_s30 }
 0x401   : > { %s2926_s10 = scalar_lea.vmem %s1942_s30, 2560  ;;  %p2933_p6 = scmp.lt.s32.totalorder %s1942_s30, %s1942_s30 }
 0x402   : > { %p2927_p9 = scmp.ne.s32.totalorder %s1942_s30, %s2926_s10  ;;  %p2934_p13 = scmp.lt.s32.totalorder %s2926_s10, %s2926_s10 }
 0x404   : > { %p2928_p12 = pnand %p2927_p9, %p2568_p7  ;;  %p2935_p3 = por %p2934_p13, %p2933_p6 }
 0x406   : > { %p2929_p10 = pneg %p2928_p12 }
 0x408   : > { %p2936_p2 = pnand %p2935_p3, %p2929_p10 }
 0x40a   : > { %2939 = shalt.err (!%p2936_p2)
}
 0x40b   : > { %s2940_s12 = scalar_lea.hbm %s4048_s4, 2560 }
 0x40c   : > { %p2941_p8 = scmp.ne.s32.totalorder %s4048_s4, %s2940_s12  ;;  %p2946_p0 = scmp.lt.u32.totalorder %s2940_s12, %s4048_s4 }
 0x40e   : > { %p2942_p5 = pnand %p2941_p8, %p2568_p7 }
 0x410   : > { %p2943_p11 = pneg %p2942_p5 }
 0x412   : > { %p2948_p1 = pnand %p2946_p0, %p2943_p11 }
 0x414   : > { %2951 = shalt.err (!%p2948_p1)
}
 0x415   : > { %s3027_s29 = smov 256   ;;  %s3028_s25 = smov 16  }
 0x416   : > { %2548 = dma.vmem_to_hbm [thread:$0]  (%p2568_p7), %s1942_s30, 2560, %s4048_s4, [#allocation5], %s3027_s29, %s3027_s29, %s3028_s25  }
 0x417   : > { %2989 = dma.done.wait (%p2568_p7), [#allocation5], 2560  }
 0x418   : > { %2991 = vsyncadd (%p2568_p7), [#allocation5], 4294964736 }
 0x419 PF: > { %s22_s20 = sadd.s32 1, %s3014_s20   ;;  %s4078_s15 = smov %s2998_s16 }
 0x41a   : > { %p19_p4 = scmp.ge.s32.totalorder %s22_s20, 4   ;;  %s4079_s16 = smov %s3002_s17 }
 0x41b   : > { %s4080_s17 = smov %s3101_s27  ;;  %s4081_s18 = smov %s3010_s19 }
 0x41c   : > { %s4082_s19 = smov %s4084_s21  ;;  %21 = sbr.rel (!%p19_p4) target bundleno = 11 (0xb), region = 112 }
 0x423   :  { %1957 = vsyncpa [#allocation4], 1 }
 0x424   :  { %1959 = vsyncpa [#allocation4 + $0x1], 1 }
 0x425   :  { %1960 = vsyncpa [#allocation7], 1 }
 0x426   :  { %1962 = vsyncpa [#allocation7 + $0x1], 1 }
 0x427   :  { %1963 = vsyncpa [#allocation10], 1 }
 0x428   :  { %1965 = vsyncpa [#allocation10 + $0x1], 1 }
 0x429   :  { %1966 = vsyncpa [#allocation5], 1 }
 0x42a   :  { %1968 = vsyncpa [#allocation5 + $0x1], 1 }

</bundles_post_ra>
